<compile_context>
chip_gen: v5e
topology: v5e:2x2
jax: 0.10.0
libtpu: 0.0.40
codegen_flags: <defaults>
</compile_context>

<pallas_src>
import math

import numpy as np
import jax
import jax.numpy as jnp
from jax.experimental import pallas as pl
from jax.experimental.pallas import tpu as pltpu


# -----------------------------------------------------------------------------
# small helpers
# -----------------------------------------------------------------------------
_SQRT_HALF = 0.7071067811865476
_SQRT_2_OVER_PI = 0.7978845608028654


def _round_up(x, m):
    return ((x + m - 1) // m) * m


def _erf_via_exp(x):
    # Abramowitz & Stegun 7.1.26, |error| <= 1.5e-7.  Built from exp (EUP) plus
    # a short polynomial (VPU) so it avoids a long erf expansion on the VALU.
    p = 0.3275911
    a1, a2, a3, a4, a5 = (0.254829592, -0.284496736, 1.421413741,
                          -1.453152027, 1.061405429)
    ax = jnp.abs(x)
    t = 1.0 / (1.0 + p * ax)
    poly = ((((a5 * t + a4) * t + a3) * t + a2) * t + a1) * t
    y = 1.0 - poly * jnp.exp(-(ax * ax))
    return jnp.where(x >= 0.0, y, -y)


def _gelu_f32(x, approximate):
    if approximate:
        inner = _SQRT_2_OVER_PI * (x + 0.044715 * (x * x * x))
        return 0.5 * x * (1.0 + jnp.tanh(inner))
    # Near-exact erf GELU (matches PyTorch F.gelu default to ~1e-6).
    return 0.5 * x * (1.0 + _erf_via_exp(x * _SQRT_HALF))


def _default_vmem_budget_bytes():
    # Generation-aware VMEM budget: 3/4 of the queried capacity (v5e/v6e:
    # 128 MiB, v7x: 64 MiB), with a v7x-safe fallback when the query fails.
    try:
        cap = int(pltpu.get_tpu_info().vmem_capacity_bytes)
    except Exception:
        cap = 64 * 1024 * 1024
    return (cap * 3) // 4


def _estimate_group_vmem_bytes(group, T_pad, itemsize):
    """Generous upper bound of the VMEM working set of one fused group."""
    total = 0
    max_c = 1
    for p in group:
        K, ci, co = (int(s) for s in p["w1"].shape)
        max_c = max(max_c, ci, co)
        w_elems = K * ci * co + K * co * co + 2 * co
        if p["wp"] is not None:
            w_elems += ci * co + co
        total += 2 * w_elems * itemsize            # double-buffered weight blocks
        total += 10 * T_pad * max(ci, co) * 4      # f32 conv / GELU temporaries
    total += 4 * T_pad * max_c * itemsize          # double-buffered activation in/out
    return total


def _group_blocks_by_vmem(params, T_pad, itemsize, budget_bytes):
    """Greedily fuse consecutive ConvBlocks while the group fits the budget."""
    groups, cur = [], []
    for p in params:
        cand = cur + [p]
        if cur and _estimate_group_vmem_bytes(cand, T_pad, itemsize) > budget_bytes:
            groups.append(cur)
            cur = [p]
        else:
            cur = cand
    if cur:
        groups.append(cur)
    return groups


def _const_index_map(ndim):
    # Constant block index => the tile is fetched once and reused across the
    # whole grid (weights stay VMEM-resident).
    return lambda b, _n=ndim: (0,) * _n


# -----------------------------------------------------------------------------
# fused multi-ConvBlock kernel
# -----------------------------------------------------------------------------
def _make_fused_kernel(block_meta, T_pad, T_valid, model_dtype, approximate_gelu):
    """block_meta: tuple of (K, dilation, pad, has_proj) per fused ConvBlock."""
    need_mask = T_pad > T_valid    # static; skipped entirely in the aligned case

    def conv1d(g, w_ref, b_ref, K, dilation, pad):
        # g: (T_pad, C_in) in the model dtype with rows >= T_valid == 0.
        # Returns the SAME-padded dilated conv in f32, shape (T_pad, C_out).
        if pad > 0:
            zpad = jnp.zeros((pad, g.shape[1]), dtype=g.dtype)
            gp = jnp.concatenate([zpad, g, zpad], axis=0)
        else:
            gp = g
        # K accumulated matmuls (no im2col concat buffer), f32 accumulation.
        acc = None
        for j in range(K):
            lhs = gp[j * dilation:j * dilation + T_pad, :]
            part = jnp.dot(lhs, w_ref[j], preferred_element_type=jnp.float32)
            acc = part if acc is None else acc + part
        return acc + b_ref[...].astype(jnp.float32)

    def kernel(x_ref, *refs):
        out_ref = refs[-1]
        wrefs = refs[:-1]

        if need_mask:
            rows = jax.lax.broadcasted_iota(jnp.int32, (T_pad, 1), 0)
            in_seq = rows < T_valid

        act = x_ref[...]                              # (T_pad, C_in0), model dtype
        i = 0
        for (K, dilation, pad, has_proj) in block_meta:
            w1_ref, b1_ref, w2_ref, b2_ref = wrefs[i:i + 4]
            i += 4

            # residual branch (identity or 1x1 projector) on the raw input.
            if has_proj:
                wp_ref, bp_ref = wrefs[i:i + 2]
                i += 2
                res = jnp.dot(act, wp_ref[...], preferred_element_type=jnp.float32)
                res = res + bp_ref[...].astype(jnp.float32)
            else:
                res = act.astype(jnp.float32)

            # gelu -> conv1 -> gelu -> conv2, all VMEM-resident.  GELU math in
            # f32, MXU operands cast back to the model dtype.
            g1 = _gelu_f32(act.astype(jnp.float32), approximate_gelu)
            h1 = conv1d(g1.astype(model_dtype), w1_ref, b1_ref, K, dilation, pad)
            if need_mask:
                # conv2 must see zero padding of gelu(conv1(x)) beyond T_valid
                # (bias makes the pad rows non-zero otherwise).
                h1 = jnp.where(in_seq, h1, 0.0)
            g2 = _gelu_f32(h1, approximate_gelu)
            h2 = conv1d(g2.astype(model_dtype), w2_ref, b2_ref, K, dilation, pad)

            out = h2 + res
            if need_mask:
                # keep rows >= T_valid exactly zero for the next block / group.
                out = jnp.where(in_seq, out, 0.0)
            act = out.astype(model_dtype)

        out_ref[...] = act

    return kernel


def _fused_blocks_call(x_btc, group, T_valid, approximate_gelu):
    """One pallas_call fusing the ConvBlocks in `group`.  x_btc: (B, T_pad, C)."""
    B, T_pad, C_in0 = (int(s) for s in x_btc.shape)
    dtype = x_btc.dtype
    itemsize = jnp.dtype(dtype).itemsize
    C_out = int(group[-1]["w1"].shape[2])

    meta, winputs = [], []
    flops = trans = w_elems = 0
    for p in group:
        K, ci, co = (int(s) for s in p["w1"].shape)
        d = int(p["dilation"])
        pad = ((K - 1) * d + 1) // 2
        has_proj = p["wp"] is not None
        meta.append((K, d, pad, has_proj))
        winputs += [p["w1"].astype(dtype),
                    jnp.reshape(p["b1"], (1, co)).astype(dtype),
                    p["w2"].astype(dtype),
                    jnp.reshape(p["b2"], (1, co)).astype(dtype)]
        w_elems += K * ci * co + K * co * co + 2 * co
        if has_proj:
            winputs += [jnp.reshape(p["wp"], (ci, co)).astype(dtype),
                        jnp.reshape(p["bp"], (1, co)).astype(dtype)]
            w_elems += ci * co + co
            flops += 2 * T_pad * ci * co
        flops += 2 * T_pad * K * ci * co + 2 * T_pad * K * co * co
        trans += T_pad * (ci + co)

    kernel = _make_fused_kernel(tuple(meta), T_pad, T_valid, dtype, approximate_gelu)

    # x / out are tiled over batch only; all weights use constant index maps so
    # they are fetched once and stay resident across the grid.
    in_specs = [pl.BlockSpec((None, T_pad, C_in0), lambda b: (b, 0, 0))]
    for a in winputs:
        in_specs.append(pl.BlockSpec(a.shape, _const_index_map(a.ndim)))

    est = _estimate_group_vmem_bytes(group, T_pad, itemsize)
    vmem_limit = int(min(max(2 * est, 32 * 1024 * 1024), _default_vmem_budget_bytes()))

    return pl.pallas_call(
        kernel,
        out_shape=jax.ShapeDtypeStruct((B, T_pad, C_out), dtype),
        grid=(B,),
        in_specs=in_specs,
        out_specs=pl.BlockSpec((None, T_pad, C_out), lambda b: (b, 0, 0)),
        compiler_params=pltpu.CompilerParams(
            dimension_semantics=("parallel",),   # batch axis shards across TCs (v7x)
            vmem_limit_bytes=vmem_limit),
        cost_estimate=pl.CostEstimate(
            flops=int(B * flops),
            transcendentals=int(B * trans),
            bytes_accessed=int(itemsize * (B * T_pad * (C_in0 + C_out) + w_elems))),
    )(x_btc, *winputs)


# -----------------------------------------------------------------------------
# public API
# -----------------------------------------------------------------------------
def init_encoder_params(key, in_channels, channels, kernel_size):
    """Deterministic parameter init mimicking nn.Conv1d's uniform(-1/sqrt(fan), ...)."""
    params = []
    for i, out_ch in enumerate(channels):
        in_ch = channels[i - 1] if i > 0 else in_channels
        final = (i == len(channels) - 1)
        key, k1, k2, k3, k4, k5, k6 = jax.random.split(key, 7)

        def u(k, shape, fan_in):
            bound = 1.0 / math.sqrt(fan_in)
            return jax.random.uniform(k, shape, jnp.float32, -bound, bound)

        p = {
            "dilation": 2 ** i,
            "w1": u(k1, (kernel_size, in_ch, out_ch), in_ch * kernel_size),
            "b1": u(k2, (out_ch,), in_ch * kernel_size),
            "w2": u(k3, (kernel_size, out_ch, out_ch), out_ch * kernel_size),
            "b2": u(k4, (out_ch,), out_ch * kernel_size),
        }
        if in_ch != out_ch or final:
            p["wp"] = u(k5, (1, in_ch, out_ch), in_ch)
            p["bp"] = u(k6, (out_ch,), in_ch)
        else:
            p["wp"] = None
            p["bp"] = None
        params.append(p)
    return params


def dilated_conv_encoder(x_bct, params, *, approximate_gelu=False,
                         vmem_budget_bytes=None):
    """Forward pass.  x_bct: (B, C_in, T) NCL like PyTorch.  Returns (B, C_out, T)."""
    B, _, T = x_bct.shape
    x = jnp.transpose(x_bct, (0, 2, 1))               # -> (B, T, C), lanes = channels
    T_pad = _round_up(max(T, 8), 8)
    if T_pad != T:
        # one-time pad; padded rows are zero which the kernels preserve.
        x = jnp.pad(x, ((0, 0), (0, T_pad - T), (0, 0)))

    itemsize = jnp.dtype(x.dtype).itemsize
    budget = (vmem_budget_bytes if vmem_budget_bytes is not None
              else _default_vmem_budget_bytes())
    for group in _group_blocks_by_vmem(params, T_pad, itemsize, budget):
        x = _fused_blocks_call(x, group, T, approximate_gelu)

    if T_pad != T:
        x = x[:, :T, :]
    return jnp.transpose(x, (0, 2, 1))                # -> (B, C_out, T)


# -----------------------------------------------------------------------------
# pure-JAX reference (correctness checking only)
# -----------------------------------------------------------------------------
def _ref_conv(x_bct, w_kio, b, dilation):
    T = x_bct.shape[-1]
    K = w_kio.shape[0]
    rf = (K - 1) * dilation + 1
    pad = rf // 2
    w_oik = jnp.transpose(w_kio, (2, 1, 0))  # (O, I, K)
    out = jax.lax.conv_general_dilated(
        x_bct, w_oik, window_strides=(1,), padding=[(pad, pad)],
        rhs_dilation=(dilation,), dimension_numbers=("NCH", "OIH", "NCH"))
    out = out + b[None, :, None]
    return out[:, :, :T]


def _ref_encoder(x_bct, params):
    x = x_bct
    for p in params:
        if p["wp"] is not None:
            residual = _ref_conv(x, p["wp"], p["bp"], 1)
        else:
            residual = x
        h = jax.nn.gelu(x, approximate=False)
        h = _ref_conv(h, p["w1"], p["b1"], p["dilation"])
        h = jax.nn.gelu(h, approximate=False)
        h = _ref_conv(h, p["w2"], p["b2"], p["dilation"])
        x = h + residual
    return x


if __name__ == "__main__":
    key = jax.random.PRNGKey(0)
    k_x, k_x2, k_p = jax.random.split(key, 3)

    B, C_in, T = 2, 4, 16
    channels = [8, 8, 16]
    kernel_size = 3

    x = jax.random.normal(k_x, (B, C_in, T), jnp.float32)
    params = init_encoder_params(k_p, C_in, channels, kernel_size)
    ref = jax.block_until_ready(_ref_encoder(x, params))

    # 1) fully fused encoder: a single pallas_call for all three ConvBlocks.
    out = jax.block_until_ready(dilated_conv_encoder(x, params))
    assert out.shape == (B, channels[-1], T), out.shape
    np.testing.assert_allclose(np.asarray(out), np.asarray(ref), rtol=1e-4, atol=1e-4)

    # 2) forced group splitting (one block per pallas_call) — exercises the
    #    multi-call path and the activation hand-off between groups.
    out_split = jax.block_until_ready(
        dilated_conv_encoder(x, params, vmem_budget_bytes=1))
    np.testing.assert_allclose(np.asarray(out_split), np.asarray(ref),
                               rtol=1e-4, atol=1e-4)

    # 3) sequence length not a multiple of 8 — exercises the row-mask path.
    T2 = 13
    x2 = jax.random.normal(k_x2, (B, C_in, T2), jnp.float32)
    ref2 = jax.block_until_ready(_ref_encoder(x2, params))
    out2 = jax.block_until_ready(dilated_conv_encoder(x2, params))
    np.testing.assert_allclose(np.asarray(out2), np.asarray(ref2),
                               rtol=1e-4, atol=1e-4)

    print("KERNEL_OK")
</pallas_src>

<mosaic_0001>
module attributes {stable_mosaic.version = 11 : i64} {
  func.func @kernel(%arg0: i32, %arg1: memref<1x16x4xf32, #tpu.memory_space<vmem>>, %arg2: memref<3x4x8xf32, #tpu.memory_space<vmem>>, %arg3: memref<1x8xf32, #tpu.memory_space<vmem>>, %arg4: memref<3x8x8xf32, #tpu.memory_space<vmem>>, %arg5: memref<1x8xf32, #tpu.memory_space<vmem>>, %arg6: memref<4x8xf32, #tpu.memory_space<vmem>>, %arg7: memref<1x8xf32, #tpu.memory_space<vmem>>, %arg8: memref<3x8x8xf32, #tpu.memory_space<vmem>>, %arg9: memref<1x8xf32, #tpu.memory_space<vmem>>, %arg10: memref<3x8x8xf32, #tpu.memory_space<vmem>>, %arg11: memref<1x8xf32, #tpu.memory_space<vmem>>, %arg12: memref<3x8x16xf32, #tpu.memory_space<vmem>>, %arg13: memref<1x16xf32, #tpu.memory_space<vmem>>, %arg14: memref<3x16x16xf32, #tpu.memory_space<vmem>>, %arg15: memref<1x16xf32, #tpu.memory_space<vmem>>, %arg16: memref<8x16xf32, #tpu.memory_space<vmem>>, %arg17: memref<1x16xf32, #tpu.memory_space<vmem>>, %arg18: memref<1x16x16xf32, #tpu.memory_space<vmem>>) attributes {dimension_semantics = [#tpu.dimension_semantics<parallel>], iteration_bounds = array<i64: 2>, scalar_prefetch = 0 : i64, scratch_operands = 0 : i64, tpu.core_type = #tpu.core_type<tc>, window_params = [{transform_indices = @transform_0, window_bounds = array<i64: 1, 16, 4>}, {pipeline_mode = #tpu.pipeline_mode<synchronous>, transform_indices = @transform_1, window_bounds = array<i64: 3, 4, 8>}, {pipeline_mode = #tpu.pipeline_mode<synchronous>, transform_indices = @transform_2, window_bounds = array<i64: 1, 8>}, {pipeline_mode = #tpu.pipeline_mode<synchronous>, transform_indices = @transform_3, window_bounds = array<i64: 3, 8, 8>}, {pipeline_mode = #tpu.pipeline_mode<synchronous>, transform_indices = @transform_4, window_bounds = array<i64: 1, 8>}, {pipeline_mode = #tpu.pipeline_mode<synchronous>, transform_indices = @transform_5, window_bounds = array<i64: 4, 8>}, {pipeline_mode = #tpu.pipeline_mode<synchronous>, transform_indices = @transform_6, window_bounds = array<i64: 1, 8>}, {pipeline_mode = #tpu.pipeline_mode<synchronous>, transform_indices = @transform_7, window_bounds = array<i64: 3, 8, 8>}, {pipeline_mode = #tpu.pipeline_mode<synchronous>, transform_indices = @transform_8, window_bounds = array<i64: 1, 8>}, {pipeline_mode = #tpu.pipeline_mode<synchronous>, transform_indices = @transform_9, window_bounds = array<i64: 3, 8, 8>}, {pipeline_mode = #tpu.pipeline_mode<synchronous>, transform_indices = @transform_10, window_bounds = array<i64: 1, 8>}, {pipeline_mode = #tpu.pipeline_mode<synchronous>, transform_indices = @transform_11, window_bounds = array<i64: 3, 8, 16>}, {pipeline_mode = #tpu.pipeline_mode<synchronous>, transform_indices = @transform_12, window_bounds = array<i64: 1, 16>}, {pipeline_mode = #tpu.pipeline_mode<synchronous>, transform_indices = @transform_13, window_bounds = array<i64: 3, 16, 16>}, {pipeline_mode = #tpu.pipeline_mode<synchronous>, transform_indices = @transform_14, window_bounds = array<i64: 1, 16>}, {pipeline_mode = #tpu.pipeline_mode<synchronous>, transform_indices = @transform_15, window_bounds = array<i64: 8, 16>}, {pipeline_mode = #tpu.pipeline_mode<synchronous>, transform_indices = @transform_16, window_bounds = array<i64: 1, 16>}, {transform_indices = @transform_17, window_bounds = array<i64: 1, 16, 16>}]} {
    %c0 = arith.constant 0 : index
    %c0_0 = arith.constant 0 : index
    %c0_1 = arith.constant 0 : index
    %0 = vector.load %arg1[%c0, %c0_0, %c0_1] : memref<1x16x4xf32, #tpu.memory_space<vmem>>, vector<1x16x4xf32>
    %1 = vector.shape_cast %0 : vector<1x16x4xf32> to vector<16x4xf32>
    %c0_2 = arith.constant 0 : index
    %c0_3 = arith.constant 0 : index
    %2 = vector.load %arg6[%c0_2, %c0_3] : memref<4x8xf32, #tpu.memory_space<vmem>>, vector<4x8xf32>
    %cst = arith.constant dense<0.000000e+00> : vector<16x8xf32>
    %3 = tpu.matmul %1, %2, %cst {dimension_numbers = #tpu.dot_dimension_numbers<[1], [0], [0], [1], [0, 0, 1, 1], [], []>} : vector<16x4xf32>, vector<4x8xf32>, vector<16x8xf32> -> vector<16x8xf32>
    %c0_4 = arith.constant 0 : index
    %c0_5 = arith.constant 0 : index
    %4 = vector.load %arg7[%c0_4, %c0_5] : memref<1x8xf32, #tpu.memory_space<vmem>>, vector<1x8xf32>
    %5 = vector.broadcast %4 : vector<1x8xf32> to vector<16x8xf32>
    %6 = arith.addf %3, %5 : vector<16x8xf32>
    %cst_6 = arith.constant 5.000000e-01 : f32
    %7 = vector.broadcast %cst_6 : f32 to vector<16x4xf32>
    %8 = arith.mulf %7, %1 : vector<16x4xf32>
    %cst_7 = arith.constant 0.707106769 : f32
    %9 = vector.broadcast %cst_7 : f32 to vector<16x4xf32>
    %10 = arith.mulf %1, %9 : vector<16x4xf32>
    %11 = math.absf %10 : vector<16x4xf32>
    %cst_8 = arith.constant 0.327591091 : f32
    %12 = vector.broadcast %cst_8 : f32 to vector<16x4xf32>
    %13 = arith.mulf %12, %11 : vector<16x4xf32>
    %cst_9 = arith.constant 1.000000e+00 : f32
    %14 = vector.broadcast %cst_9 : f32 to vector<16x4xf32>
    %15 = arith.addf %14, %13 : vector<16x4xf32>
    %cst_10 = arith.constant 1.000000e+00 : f32
    %16 = vector.broadcast %cst_10 : f32 to vector<16x4xf32>
    %17 = arith.divf %16, %15 : vector<16x4xf32>
    %cst_11 = arith.constant 1.06140542 : f32
    %18 = vector.broadcast %cst_11 : f32 to vector<16x4xf32>
    %19 = arith.mulf %18, %17 : vector<16x4xf32>
    %cst_12 = arith.constant -1.45315206 : f32
    %20 = vector.broadcast %cst_12 : f32 to vector<16x4xf32>
    %21 = arith.addf %19, %20 : vector<16x4xf32>
    %22 = arith.mulf %21, %17 : vector<16x4xf32>
    %cst_13 = arith.constant 1.42141378 : f32
    %23 = vector.broadcast %cst_13 : f32 to vector<16x4xf32>
    %24 = arith.addf %22, %23 : vector<16x4xf32>
    %25 = arith.mulf %24, %17 : vector<16x4xf32>
    %cst_14 = arith.constant -0.284496725 : f32
    %26 = vector.broadcast %cst_14 : f32 to vector<16x4xf32>
    %27 = arith.addf %25, %26 : vector<16x4xf32>
    %28 = arith.mulf %27, %17 : vector<16x4xf32>
    %cst_15 = arith.constant 0.254829586 : f32
    %29 = vector.broadcast %cst_15 : f32 to vector<16x4xf32>
    %30 = arith.addf %28, %29 : vector<16x4xf32>
    %31 = arith.mulf %30, %17 : vector<16x4xf32>
    %32 = arith.mulf %11, %11 : vector<16x4xf32>
    %cst_16 = arith.constant 0.000000e+00 : f32
    %33 = vector.broadcast %cst_16 : f32 to vector<16x4xf32>
    %34 = arith.subf %33, %32 : vector<16x4xf32>
    %35 = math.exp %34 : vector<16x4xf32>
    %36 = arith.mulf %31, %35 : vector<16x4xf32>
    %cst_17 = arith.constant 1.000000e+00 : f32
    %37 = vector.broadcast %cst_17 : f32 to vector<16x4xf32>
    %38 = arith.subf %37, %36 : vector<16x4xf32>
    %cst_18 = arith.constant 0.000000e+00 : f32
    %39 = vector.broadcast %cst_18 : f32 to vector<16x4xf32>
    %40 = arith.cmpf oge, %10, %39 : vector<16x4xf32>
    %cst_19 = arith.constant 0.000000e+00 : f32
    %41 = vector.broadcast %cst_19 : f32 to vector<16x4xf32>
    %42 = arith.subf %41, %38 : vector<16x4xf32>
    %43 = arith.select %40, %38, %42 : vector<16x4xi1>, vector<16x4xf32>
    %cst_20 = arith.constant 1.000000e+00 : f32
    %44 = vector.broadcast %cst_20 : f32 to vector<16x4xf32>
    %45 = arith.addf %44, %43 : vector<16x4xf32>
    %46 = arith.mulf %8, %45 : vector<16x4xf32>
    %cst_21 = arith.constant 0.000000e+00 : f32
    %47 = vector.broadcast %cst_21 : f32 to vector<1x4xf32>
    %48 = tpu.concatenate %47, %46, %47 in 0 : vector<1x4xf32>, vector<16x4xf32>, vector<1x4xf32> -> vector<18x4xf32>
    %49 = vector.extract_strided_slice %48 {offsets = [0, 0], sizes = [16, 4], strides = [1, 1]} : vector<18x4xf32> to vector<16x4xf32>
    %c0_22 = arith.constant 0 : index
    %c0_23 = arith.constant 0 : index
    %c0_24 = arith.constant 0 : index
    %50 = vector.load %arg2[%c0_22, %c0_23, %c0_24] : memref<3x4x8xf32, #tpu.memory_space<vmem>>, vector<1x4x8xf32>
    %51 = vector.shape_cast %50 : vector<1x4x8xf32> to vector<4x8xf32>
    %cst_25 = arith.constant dense<0.000000e+00> : vector<16x8xf32>
    %52 = tpu.matmul %49, %51, %cst_25 {dimension_numbers = #tpu.dot_dimension_numbers<[1], [0], [0], [1], [0, 0, 1, 1], [], []>} : vector<16x4xf32>, vector<4x8xf32>, vector<16x8xf32> -> vector<16x8xf32>
    %53 = vector.extract_strided_slice %48 {offsets = [1, 0], sizes = [16, 4], strides = [1, 1]} : vector<18x4xf32> to vector<16x4xf32>
    %c1 = arith.constant 1 : index
    %c0_26 = arith.constant 0 : index
    %c0_27 = arith.constant 0 : index
    %54 = vector.load %arg2[%c1, %c0_26, %c0_27] : memref<3x4x8xf32, #tpu.memory_space<vmem>>, vector<1x4x8xf32>
    %55 = vector.shape_cast %54 : vector<1x4x8xf32> to vector<4x8xf32>
    %cst_28 = arith.constant dense<0.000000e+00> : vector<16x8xf32>
    %56 = tpu.matmul %53, %55, %cst_28 {dimension_numbers = #tpu.dot_dimension_numbers<[1], [0], [0], [1], [0, 0, 1, 1], [], []>} : vector<16x4xf32>, vector<4x8xf32>, vector<16x8xf32> -> vector<16x8xf32>
    %57 = arith.addf %52, %56 : vector<16x8xf32>
    %58 = vector.extract_strided_slice %48 {offsets = [2, 0], sizes = [16, 4], strides = [1, 1]} : vector<18x4xf32> to vector<16x4xf32>
    %c2 = arith.constant 2 : index
    %c0_29 = arith.constant 0 : index
    %c0_30 = arith.constant 0 : index
    %59 = vector.load %arg2[%c2, %c0_29, %c0_30] : memref<3x4x8xf32, #tpu.memory_space<vmem>>, vector<1x4x8xf32>
    %60 = vector.shape_cast %59 : vector<1x4x8xf32> to vector<4x8xf32>
    %cst_31 = arith.constant dense<0.000000e+00> : vector<16x8xf32>
    %61 = tpu.matmul %58, %60, %cst_31 {dimension_numbers = #tpu.dot_dimension_numbers<[1], [0], [0], [1], [0, 0, 1, 1], [], []>} : vector<16x4xf32>, vector<4x8xf32>, vector<16x8xf32> -> vector<16x8xf32>
    %62 = arith.addf %57, %61 : vector<16x8xf32>
    %c0_32 = arith.constant 0 : index
    %c0_33 = arith.constant 0 : index
    %63 = vector.load %arg3[%c0_32, %c0_33] : memref<1x8xf32, #tpu.memory_space<vmem>>, vector<1x8xf32>
    %64 = vector.broadcast %63 : vector<1x8xf32> to vector<16x8xf32>
    %65 = arith.addf %62, %64 : vector<16x8xf32>
    %cst_34 = arith.constant 5.000000e-01 : f32
    %66 = vector.broadcast %cst_34 : f32 to vector<16x8xf32>
    %67 = arith.mulf %66, %65 : vector<16x8xf32>
    %cst_35 = arith.constant 0.707106769 : f32
    %68 = vector.broadcast %cst_35 : f32 to vector<16x8xf32>
    %69 = arith.mulf %65, %68 : vector<16x8xf32>
    %70 = math.absf %69 : vector<16x8xf32>
    %cst_36 = arith.constant 0.327591091 : f32
    %71 = vector.broadcast %cst_36 : f32 to vector<16x8xf32>
    %72 = arith.mulf %71, %70 : vector<16x8xf32>
    %cst_37 = arith.constant 1.000000e+00 : f32
    %73 = vector.broadcast %cst_37 : f32 to vector<16x8xf32>
    %74 = arith.addf %73, %72 : vector<16x8xf32>
    %cst_38 = arith.constant 1.000000e+00 : f32
    %75 = vector.broadcast %cst_38 : f32 to vector<16x8xf32>
    %76 = arith.divf %75, %74 : vector<16x8xf32>
    %cst_39 = arith.constant 1.06140542 : f32
    %77 = vector.broadcast %cst_39 : f32 to vector<16x8xf32>
    %78 = arith.mulf %77, %76 : vector<16x8xf32>
    %cst_40 = arith.constant -1.45315206 : f32
    %79 = vector.broadcast %cst_40 : f32 to vector<16x8xf32>
    %80 = arith.addf %78, %79 : vector<16x8xf32>
    %81 = arith.mulf %80, %76 : vector<16x8xf32>
    %cst_41 = arith.constant 1.42141378 : f32
    %82 = vector.broadcast %cst_41 : f32 to vector<16x8xf32>
    %83 = arith.addf %81, %82 : vector<16x8xf32>
    %84 = arith.mulf %83, %76 : vector<16x8xf32>
    %cst_42 = arith.constant -0.284496725 : f32
    %85 = vector.broadcast %cst_42 : f32 to vector<16x8xf32>
    %86 = arith.addf %84, %85 : vector<16x8xf32>
    %87 = arith.mulf %86, %76 : vector<16x8xf32>
    %cst_43 = arith.constant 0.254829586 : f32
    %88 = vector.broadcast %cst_43 : f32 to vector<16x8xf32>
    %89 = arith.addf %87, %88 : vector<16x8xf32>
    %90 = arith.mulf %89, %76 : vector<16x8xf32>
    %91 = arith.mulf %70, %70 : vector<16x8xf32>
    %cst_44 = arith.constant 0.000000e+00 : f32
    %92 = vector.broadcast %cst_44 : f32 to vector<16x8xf32>
    %93 = arith.subf %92, %91 : vector<16x8xf32>
    %94 = math.exp %93 : vector<16x8xf32>
    %95 = arith.mulf %90, %94 : vector<16x8xf32>
    %cst_45 = arith.constant 1.000000e+00 : f32
    %96 = vector.broadcast %cst_45 : f32 to vector<16x8xf32>
    %97 = arith.subf %96, %95 : vector<16x8xf32>
    %cst_46 = arith.constant 0.000000e+00 : f32
    %98 = vector.broadcast %cst_46 : f32 to vector<16x8xf32>
    %99 = arith.cmpf oge, %69, %98 : vector<16x8xf32>
    %cst_47 = arith.constant 0.000000e+00 : f32
    %100 = vector.broadcast %cst_47 : f32 to vector<16x8xf32>
    %101 = arith.subf %100, %97 : vector<16x8xf32>
    %102 = arith.select %99, %97, %101 : vector<16x8xi1>, vector<16x8xf32>
    %cst_48 = arith.constant 1.000000e+00 : f32
    %103 = vector.broadcast %cst_48 : f32 to vector<16x8xf32>
    %104 = arith.addf %103, %102 : vector<16x8xf32>
    %105 = arith.mulf %67, %104 : vector<16x8xf32>
    %cst_49 = arith.constant 0.000000e+00 : f32
    %106 = vector.broadcast %cst_49 : f32 to vector<1x8xf32>
    %107 = tpu.concatenate %106, %105, %106 in 0 : vector<1x8xf32>, vector<16x8xf32>, vector<1x8xf32> -> vector<18x8xf32>
    %108 = vector.extract_strided_slice %107 {offsets = [0, 0], sizes = [16, 8], strides = [1, 1]} : vector<18x8xf32> to vector<16x8xf32>
    %c0_50 = arith.constant 0 : index
    %c0_51 = arith.constant 0 : index
    %c0_52 = arith.constant 0 : index
    %109 = vector.load %arg4[%c0_50, %c0_51, %c0_52] : memref<3x8x8xf32, #tpu.memory_space<vmem>>, vector<1x8x8xf32>
    %110 = vector.shape_cast %109 : vector<1x8x8xf32> to vector<8x8xf32>
    %cst_53 = arith.constant dense<0.000000e+00> : vector<16x8xf32>
    %111 = tpu.matmul %108, %110, %cst_53 {dimension_numbers = #tpu.dot_dimension_numbers<[1], [0], [0], [1], [0, 0, 1, 1], [], []>} : vector<16x8xf32>, vector<8x8xf32>, vector<16x8xf32> -> vector<16x8xf32>
    %112 = vector.extract_strided_slice %107 {offsets = [1, 0], sizes = [16, 8], strides = [1, 1]} : vector<18x8xf32> to vector<16x8xf32>
    %c1_54 = arith.constant 1 : index
    %c0_55 = arith.constant 0 : index
    %c0_56 = arith.constant 0 : index
    %113 = vector.load %arg4[%c1_54, %c0_55, %c0_56] : memref<3x8x8xf32, #tpu.memory_space<vmem>>, vector<1x8x8xf32>
    %114 = vector.shape_cast %113 : vector<1x8x8xf32> to vector<8x8xf32>
    %cst_57 = arith.constant dense<0.000000e+00> : vector<16x8xf32>
    %115 = tpu.matmul %112, %114, %cst_57 {dimension_numbers = #tpu.dot_dimension_numbers<[1], [0], [0], [1], [0, 0, 1, 1], [], []>} : vector<16x8xf32>, vector<8x8xf32>, vector<16x8xf32> -> vector<16x8xf32>
    %116 = arith.addf %111, %115 : vector<16x8xf32>
    %117 = vector.extract_strided_slice %107 {offsets = [2, 0], sizes = [16, 8], strides = [1, 1]} : vector<18x8xf32> to vector<16x8xf32>
    %c2_58 = arith.constant 2 : index
    %c0_59 = arith.constant 0 : index
    %c0_60 = arith.constant 0 : index
    %118 = vector.load %arg4[%c2_58, %c0_59, %c0_60] : memref<3x8x8xf32, #tpu.memory_space<vmem>>, vector<1x8x8xf32>
    %119 = vector.shape_cast %118 : vector<1x8x8xf32> to vector<8x8xf32>
    %cst_61 = arith.constant dense<0.000000e+00> : vector<16x8xf32>
    %120 = tpu.matmul %117, %119, %cst_61 {dimension_numbers = #tpu.dot_dimension_numbers<[1], [0], [0], [1], [0, 0, 1, 1], [], []>} : vector<16x8xf32>, vector<8x8xf32>, vector<16x8xf32> -> vector<16x8xf32>
    %121 = arith.addf %116, %120 : vector<16x8xf32>
    %c0_62 = arith.constant 0 : index
    %c0_63 = arith.constant 0 : index
    %122 = vector.load %arg5[%c0_62, %c0_63] : memref<1x8xf32, #tpu.memory_space<vmem>>, vector<1x8xf32>
    %123 = vector.broadcast %122 : vector<1x8xf32> to vector<16x8xf32>
    %124 = arith.addf %121, %123 : vector<16x8xf32>
    %125 = arith.addf %124, %6 : vector<16x8xf32>
    %cst_64 = arith.constant 5.000000e-01 : f32
    %126 = vector.broadcast %cst_64 : f32 to vector<16x8xf32>
    %127 = arith.mulf %126, %125 : vector<16x8xf32>
    %cst_65 = arith.constant 0.707106769 : f32
    %128 = vector.broadcast %cst_65 : f32 to vector<16x8xf32>
    %129 = arith.mulf %125, %128 : vector<16x8xf32>
    %130 = math.absf %129 : vector<16x8xf32>
    %cst_66 = arith.constant 0.327591091 : f32
    %131 = vector.broadcast %cst_66 : f32 to vector<16x8xf32>
    %132 = arith.mulf %131, %130 : vector<16x8xf32>
    %cst_67 = arith.constant 1.000000e+00 : f32
    %133 = vector.broadcast %cst_67 : f32 to vector<16x8xf32>
    %134 = arith.addf %133, %132 : vector<16x8xf32>
    %cst_68 = arith.constant 1.000000e+00 : f32
    %135 = vector.broadcast %cst_68 : f32 to vector<16x8xf32>
    %136 = arith.divf %135, %134 : vector<16x8xf32>
    %cst_69 = arith.constant 1.06140542 : f32
    %137 = vector.broadcast %cst_69 : f32 to vector<16x8xf32>
    %138 = arith.mulf %137, %136 : vector<16x8xf32>
    %cst_70 = arith.constant -1.45315206 : f32
    %139 = vector.broadcast %cst_70 : f32 to vector<16x8xf32>
    %140 = arith.addf %138, %139 : vector<16x8xf32>
    %141 = arith.mulf %140, %136 : vector<16x8xf32>
    %cst_71 = arith.constant 1.42141378 : f32
    %142 = vector.broadcast %cst_71 : f32 to vector<16x8xf32>
    %143 = arith.addf %141, %142 : vector<16x8xf32>
    %144 = arith.mulf %143, %136 : vector<16x8xf32>
    %cst_72 = arith.constant -0.284496725 : f32
    %145 = vector.broadcast %cst_72 : f32 to vector<16x8xf32>
    %146 = arith.addf %144, %145 : vector<16x8xf32>
    %147 = arith.mulf %146, %136 : vector<16x8xf32>
    %cst_73 = arith.constant 0.254829586 : f32
    %148 = vector.broadcast %cst_73 : f32 to vector<16x8xf32>
    %149 = arith.addf %147, %148 : vector<16x8xf32>
    %150 = arith.mulf %149, %136 : vector<16x8xf32>
    %151 = arith.mulf %130, %130 : vector<16x8xf32>
    %cst_74 = arith.constant 0.000000e+00 : f32
    %152 = vector.broadcast %cst_74 : f32 to vector<16x8xf32>
    %153 = arith.subf %152, %151 : vector<16x8xf32>
    %154 = math.exp %153 : vector<16x8xf32>
    %155 = arith.mulf %150, %154 : vector<16x8xf32>
    %cst_75 = arith.constant 1.000000e+00 : f32
    %156 = vector.broadcast %cst_75 : f32 to vector<16x8xf32>
    %157 = arith.subf %156, %155 : vector<16x8xf32>
    %cst_76 = arith.constant 0.000000e+00 : f32
    %158 = vector.broadcast %cst_76 : f32 to vector<16x8xf32>
    %159 = arith.cmpf oge, %129, %158 : vector<16x8xf32>
    %cst_77 = arith.constant 0.000000e+00 : f32
    %160 = vector.broadcast %cst_77 : f32 to vector<16x8xf32>
    %161 = arith.subf %160, %157 : vector<16x8xf32>
    %162 = arith.select %159, %157, %161 : vector<16x8xi1>, vector<16x8xf32>
    %cst_78 = arith.constant 1.000000e+00 : f32
    %163 = vector.broadcast %cst_78 : f32 to vector<16x8xf32>
    %164 = arith.addf %163, %162 : vector<16x8xf32>
    %165 = arith.mulf %127, %164 : vector<16x8xf32>
    %cst_79 = arith.constant 0.000000e+00 : f32
    %166 = vector.broadcast %cst_79 : f32 to vector<2x8xf32>
    %167 = tpu.concatenate %166, %165, %166 in 0 : vector<2x8xf32>, vector<16x8xf32>, vector<2x8xf32> -> vector<20x8xf32>
    %168 = vector.extract_strided_slice %167 {offsets = [0, 0], sizes = [16, 8], strides = [1, 1]} : vector<20x8xf32> to vector<16x8xf32>
    %c0_80 = arith.constant 0 : index
    %c0_81 = arith.constant 0 : index
    %c0_82 = arith.constant 0 : index
    %169 = vector.load %arg8[%c0_80, %c0_81, %c0_82] : memref<3x8x8xf32, #tpu.memory_space<vmem>>, vector<1x8x8xf32>
    %170 = vector.shape_cast %169 : vector<1x8x8xf32> to vector<8x8xf32>
    %cst_83 = arith.constant dense<0.000000e+00> : vector<16x8xf32>
    %171 = tpu.matmul %168, %170, %cst_83 {dimension_numbers = #tpu.dot_dimension_numbers<[1], [0], [0], [1], [0, 0, 1, 1], [], []>} : vector<16x8xf32>, vector<8x8xf32>, vector<16x8xf32> -> vector<16x8xf32>
    %172 = vector.extract_strided_slice %167 {offsets = [2, 0], sizes = [16, 8], strides = [1, 1]} : vector<20x8xf32> to vector<16x8xf32>
    %c1_84 = arith.constant 1 : index
    %c0_85 = arith.constant 0 : index
    %c0_86 = arith.constant 0 : index
    %173 = vector.load %arg8[%c1_84, %c0_85, %c0_86] : memref<3x8x8xf32, #tpu.memory_space<vmem>>, vector<1x8x8xf32>
    %174 = vector.shape_cast %173 : vector<1x8x8xf32> to vector<8x8xf32>
    %cst_87 = arith.constant dense<0.000000e+00> : vector<16x8xf32>
    %175 = tpu.matmul %172, %174, %cst_87 {dimension_numbers = #tpu.dot_dimension_numbers<[1], [0], [0], [1], [0, 0, 1, 1], [], []>} : vector<16x8xf32>, vector<8x8xf32>, vector<16x8xf32> -> vector<16x8xf32>
    %176 = arith.addf %171, %175 : vector<16x8xf32>
    %177 = vector.extract_strided_slice %167 {offsets = [4, 0], sizes = [16, 8], strides = [1, 1]} : vector<20x8xf32> to vector<16x8xf32>
    %c2_88 = arith.constant 2 : index
    %c0_89 = arith.constant 0 : index
    %c0_90 = arith.constant 0 : index
    %178 = vector.load %arg8[%c2_88, %c0_89, %c0_90] : memref<3x8x8xf32, #tpu.memory_space<vmem>>, vector<1x8x8xf32>
    %179 = vector.shape_cast %178 : vector<1x8x8xf32> to vector<8x8xf32>
    %cst_91 = arith.constant dense<0.000000e+00> : vector<16x8xf32>
    %180 = tpu.matmul %177, %179, %cst_91 {dimension_numbers = #tpu.dot_dimension_numbers<[1], [0], [0], [1], [0, 0, 1, 1], [], []>} : vector<16x8xf32>, vector<8x8xf32>, vector<16x8xf32> -> vector<16x8xf32>
    %181 = arith.addf %176, %180 : vector<16x8xf32>
    %c0_92 = arith.constant 0 : index
    %c0_93 = arith.constant 0 : index
    %182 = vector.load %arg9[%c0_92, %c0_93] : memref<1x8xf32, #tpu.memory_space<vmem>>, vector<1x8xf32>
    %183 = vector.broadcast %182 : vector<1x8xf32> to vector<16x8xf32>
    %184 = arith.addf %181, %183 : vector<16x8xf32>
    %cst_94 = arith.constant 5.000000e-01 : f32
    %185 = vector.broadcast %cst_94 : f32 to vector<16x8xf32>
    %186 = arith.mulf %185, %184 : vector<16x8xf32>
    %cst_95 = arith.constant 0.707106769 : f32
    %187 = vector.broadcast %cst_95 : f32 to vector<16x8xf32>
    %188 = arith.mulf %184, %187 : vector<16x8xf32>
    %189 = math.absf %188 : vector<16x8xf32>
    %cst_96 = arith.constant 0.327591091 : f32
    %190 = vector.broadcast %cst_96 : f32 to vector<16x8xf32>
    %191 = arith.mulf %190, %189 : vector<16x8xf32>
    %cst_97 = arith.constant 1.000000e+00 : f32
    %192 = vector.broadcast %cst_97 : f32 to vector<16x8xf32>
    %193 = arith.addf %192, %191 : vector<16x8xf32>
    %cst_98 = arith.constant 1.000000e+00 : f32
    %194 = vector.broadcast %cst_98 : f32 to vector<16x8xf32>
    %195 = arith.divf %194, %193 : vector<16x8xf32>
    %cst_99 = arith.constant 1.06140542 : f32
    %196 = vector.broadcast %cst_99 : f32 to vector<16x8xf32>
    %197 = arith.mulf %196, %195 : vector<16x8xf32>
    %cst_100 = arith.constant -1.45315206 : f32
    %198 = vector.broadcast %cst_100 : f32 to vector<16x8xf32>
    %199 = arith.addf %197, %198 : vector<16x8xf32>
    %200 = arith.mulf %199, %195 : vector<16x8xf32>
    %cst_101 = arith.constant 1.42141378 : f32
    %201 = vector.broadcast %cst_101 : f32 to vector<16x8xf32>
    %202 = arith.addf %200, %201 : vector<16x8xf32>
    %203 = arith.mulf %202, %195 : vector<16x8xf32>
    %cst_102 = arith.constant -0.284496725 : f32
    %204 = vector.broadcast %cst_102 : f32 to vector<16x8xf32>
    %205 = arith.addf %203, %204 : vector<16x8xf32>
    %206 = arith.mulf %205, %195 : vector<16x8xf32>
    %cst_103 = arith.constant 0.254829586 : f32
    %207 = vector.broadcast %cst_103 : f32 to vector<16x8xf32>
    %208 = arith.addf %206, %207 : vector<16x8xf32>
    %209 = arith.mulf %208, %195 : vector<16x8xf32>
    %210 = arith.mulf %189, %189 : vector<16x8xf32>
    %cst_104 = arith.constant 0.000000e+00 : f32
    %211 = vector.broadcast %cst_104 : f32 to vector<16x8xf32>
    %212 = arith.subf %211, %210 : vector<16x8xf32>
    %213 = math.exp %212 : vector<16x8xf32>
    %214 = arith.mulf %209, %213 : vector<16x8xf32>
    %cst_105 = arith.constant 1.000000e+00 : f32
    %215 = vector.broadcast %cst_105 : f32 to vector<16x8xf32>
    %216 = arith.subf %215, %214 : vector<16x8xf32>
    %cst_106 = arith.constant 0.000000e+00 : f32
    %217 = vector.broadcast %cst_106 : f32 to vector<16x8xf32>
    %218 = arith.cmpf oge, %188, %217 : vector<16x8xf32>
    %cst_107 = arith.constant 0.000000e+00 : f32
    %219 = vector.broadcast %cst_107 : f32 to vector<16x8xf32>
    %220 = arith.subf %219, %216 : vector<16x8xf32>
    %221 = arith.select %218, %216, %220 : vector<16x8xi1>, vector<16x8xf32>
    %cst_108 = arith.constant 1.000000e+00 : f32
    %222 = vector.broadcast %cst_108 : f32 to vector<16x8xf32>
    %223 = arith.addf %222, %221 : vector<16x8xf32>
    %224 = arith.mulf %186, %223 : vector<16x8xf32>
    %cst_109 = arith.constant 0.000000e+00 : f32
    %225 = vector.broadcast %cst_109 : f32 to vector<2x8xf32>
    %226 = tpu.concatenate %225, %224, %225 in 0 : vector<2x8xf32>, vector<16x8xf32>, vector<2x8xf32> -> vector<20x8xf32>
    %227 = vector.extract_strided_slice %226 {offsets = [0, 0], sizes = [16, 8], strides = [1, 1]} : vector<20x8xf32> to vector<16x8xf32>
    %c0_110 = arith.constant 0 : index
    %c0_111 = arith.constant 0 : index
    %c0_112 = arith.constant 0 : index
    %228 = vector.load %arg10[%c0_110, %c0_111, %c0_112] : memref<3x8x8xf32, #tpu.memory_space<vmem>>, vector<1x8x8xf32>
    %229 = vector.shape_cast %228 : vector<1x8x8xf32> to vector<8x8xf32>
    %cst_113 = arith.constant dense<0.000000e+00> : vector<16x8xf32>
    %230 = tpu.matmul %227, %229, %cst_113 {dimension_numbers = #tpu.dot_dimension_numbers<[1], [0], [0], [1], [0, 0, 1, 1], [], []>} : vector<16x8xf32>, vector<8x8xf32>, vector<16x8xf32> -> vector<16x8xf32>
    %231 = vector.extract_strided_slice %226 {offsets = [2, 0], sizes = [16, 8], strides = [1, 1]} : vector<20x8xf32> to vector<16x8xf32>
    %c1_114 = arith.constant 1 : index
    %c0_115 = arith.constant 0 : index
    %c0_116 = arith.constant 0 : index
    %232 = vector.load %arg10[%c1_114, %c0_115, %c0_116] : memref<3x8x8xf32, #tpu.memory_space<vmem>>, vector<1x8x8xf32>
    %233 = vector.shape_cast %232 : vector<1x8x8xf32> to vector<8x8xf32>
    %cst_117 = arith.constant dense<0.000000e+00> : vector<16x8xf32>
    %234 = tpu.matmul %231, %233, %cst_117 {dimension_numbers = #tpu.dot_dimension_numbers<[1], [0], [0], [1], [0, 0, 1, 1], [], []>} : vector<16x8xf32>, vector<8x8xf32>, vector<16x8xf32> -> vector<16x8xf32>
    %235 = arith.addf %230, %234 : vector<16x8xf32>
    %236 = vector.extract_strided_slice %226 {offsets = [4, 0], sizes = [16, 8], strides = [1, 1]} : vector<20x8xf32> to vector<16x8xf32>
    %c2_118 = arith.constant 2 : index
    %c0_119 = arith.constant 0 : index
    %c0_120 = arith.constant 0 : index
    %237 = vector.load %arg10[%c2_118, %c0_119, %c0_120] : memref<3x8x8xf32, #tpu.memory_space<vmem>>, vector<1x8x8xf32>
    %238 = vector.shape_cast %237 : vector<1x8x8xf32> to vector<8x8xf32>
    %cst_121 = arith.constant dense<0.000000e+00> : vector<16x8xf32>
    %239 = tpu.matmul %236, %238, %cst_121 {dimension_numbers = #tpu.dot_dimension_numbers<[1], [0], [0], [1], [0, 0, 1, 1], [], []>} : vector<16x8xf32>, vector<8x8xf32>, vector<16x8xf32> -> vector<16x8xf32>
    %240 = arith.addf %235, %239 : vector<16x8xf32>
    %c0_122 = arith.constant 0 : index
    %c0_123 = arith.constant 0 : index
    %241 = vector.load %arg11[%c0_122, %c0_123] : memref<1x8xf32, #tpu.memory_space<vmem>>, vector<1x8xf32>
    %242 = vector.broadcast %241 : vector<1x8xf32> to vector<16x8xf32>
    %243 = arith.addf %240, %242 : vector<16x8xf32>
    %244 = arith.addf %243, %125 : vector<16x8xf32>
    %c0_124 = arith.constant 0 : index
    %c0_125 = arith.constant 0 : index
    %245 = vector.load %arg16[%c0_124, %c0_125] : memref<8x16xf32, #tpu.memory_space<vmem>>, vector<8x16xf32>
    %cst_126 = arith.constant dense<0.000000e+00> : vector<16x16xf32>
    %246 = tpu.matmul %244, %245, %cst_126 {dimension_numbers = #tpu.dot_dimension_numbers<[1], [0], [0], [1], [0, 0, 1, 1], [], []>} : vector<16x8xf32>, vector<8x16xf32>, vector<16x16xf32> -> vector<16x16xf32>
    %c0_127 = arith.constant 0 : index
    %c0_128 = arith.constant 0 : index
    %247 = vector.load %arg17[%c0_127, %c0_128] : memref<1x16xf32, #tpu.memory_space<vmem>>, vector<1x16xf32>
    %248 = vector.broadcast %247 : vector<1x16xf32> to vector<16x16xf32>
    %249 = arith.addf %246, %248 : vector<16x16xf32>
    %cst_129 = arith.constant 5.000000e-01 : f32
    %250 = vector.broadcast %cst_129 : f32 to vector<16x8xf32>
    %251 = arith.mulf %250, %244 : vector<16x8xf32>
    %cst_130 = arith.constant 0.707106769 : f32
    %252 = vector.broadcast %cst_130 : f32 to vector<16x8xf32>
    %253 = arith.mulf %244, %252 : vector<16x8xf32>
    %254 = math.absf %253 : vector<16x8xf32>
    %cst_131 = arith.constant 0.327591091 : f32
    %255 = vector.broadcast %cst_131 : f32 to vector<16x8xf32>
    %256 = arith.mulf %255, %254 : vector<16x8xf32>
    %cst_132 = arith.constant 1.000000e+00 : f32
    %257 = vector.broadcast %cst_132 : f32 to vector<16x8xf32>
    %258 = arith.addf %257, %256 : vector<16x8xf32>
    %cst_133 = arith.constant 1.000000e+00 : f32
    %259 = vector.broadcast %cst_133 : f32 to vector<16x8xf32>
    %260 = arith.divf %259, %258 : vector<16x8xf32>
    %cst_134 = arith.constant 1.06140542 : f32
    %261 = vector.broadcast %cst_134 : f32 to vector<16x8xf32>
    %262 = arith.mulf %261, %260 : vector<16x8xf32>
    %cst_135 = arith.constant -1.45315206 : f32
    %263 = vector.broadcast %cst_135 : f32 to vector<16x8xf32>
    %264 = arith.addf %262, %263 : vector<16x8xf32>
    %265 = arith.mulf %264, %260 : vector<16x8xf32>
    %cst_136 = arith.constant 1.42141378 : f32
    %266 = vector.broadcast %cst_136 : f32 to vector<16x8xf32>
    %267 = arith.addf %265, %266 : vector<16x8xf32>
    %268 = arith.mulf %267, %260 : vector<16x8xf32>
    %cst_137 = arith.constant -0.284496725 : f32
    %269 = vector.broadcast %cst_137 : f32 to vector<16x8xf32>
    %270 = arith.addf %268, %269 : vector<16x8xf32>
    %271 = arith.mulf %270, %260 : vector<16x8xf32>
    %cst_138 = arith.constant 0.254829586 : f32
    %272 = vector.broadcast %cst_138 : f32 to vector<16x8xf32>
    %273 = arith.addf %271, %272 : vector<16x8xf32>
    %274 = arith.mulf %273, %260 : vector<16x8xf32>
    %275 = arith.mulf %254, %254 : vector<16x8xf32>
    %cst_139 = arith.constant 0.000000e+00 : f32
    %276 = vector.broadcast %cst_139 : f32 to vector<16x8xf32>
    %277 = arith.subf %276, %275 : vector<16x8xf32>
    %278 = math.exp %277 : vector<16x8xf32>
    %279 = arith.mulf %274, %278 : vector<16x8xf32>
    %cst_140 = arith.constant 1.000000e+00 : f32
    %280 = vector.broadcast %cst_140 : f32 to vector<16x8xf32>
    %281 = arith.subf %280, %279 : vector<16x8xf32>
    %cst_141 = arith.constant 0.000000e+00 : f32
    %282 = vector.broadcast %cst_141 : f32 to vector<16x8xf32>
    %283 = arith.cmpf oge, %253, %282 : vector<16x8xf32>
    %cst_142 = arith.constant 0.000000e+00 : f32
    %284 = vector.broadcast %cst_142 : f32 to vector<16x8xf32>
    %285 = arith.subf %284, %281 : vector<16x8xf32>
    %286 = arith.select %283, %281, %285 : vector<16x8xi1>, vector<16x8xf32>
    %cst_143 = arith.constant 1.000000e+00 : f32
    %287 = vector.broadcast %cst_143 : f32 to vector<16x8xf32>
    %288 = arith.addf %287, %286 : vector<16x8xf32>
    %289 = arith.mulf %251, %288 : vector<16x8xf32>
    %cst_144 = arith.constant 0.000000e+00 : f32
    %290 = vector.broadcast %cst_144 : f32 to vector<4x8xf32>
    %291 = tpu.concatenate %290, %289, %290 in 0 : vector<4x8xf32>, vector<16x8xf32>, vector<4x8xf32> -> vector<24x8xf32>
    %292 = vector.extract_strided_slice %291 {offsets = [0, 0], sizes = [16, 8], strides = [1, 1]} : vector<24x8xf32> to vector<16x8xf32>
    %c0_145 = arith.constant 0 : index
    %c0_146 = arith.constant 0 : index
    %c0_147 = arith.constant 0 : index
    %293 = vector.load %arg12[%c0_145, %c0_146, %c0_147] : memref<3x8x16xf32, #tpu.memory_space<vmem>>, vector<1x8x16xf32>
    %294 = vector.shape_cast %293 : vector<1x8x16xf32> to vector<8x16xf32>
    %cst_148 = arith.constant dense<0.000000e+00> : vector<16x16xf32>
    %295 = tpu.matmul %292, %294, %cst_148 {dimension_numbers = #tpu.dot_dimension_numbers<[1], [0], [0], [1], [0, 0, 1, 1], [], []>} : vector<16x8xf32>, vector<8x16xf32>, vector<16x16xf32> -> vector<16x16xf32>
    %296 = vector.extract_strided_slice %291 {offsets = [4, 0], sizes = [16, 8], strides = [1, 1]} : vector<24x8xf32> to vector<16x8xf32>
    %c1_149 = arith.constant 1 : index
    %c0_150 = arith.constant 0 : index
    %c0_151 = arith.constant 0 : index
    %297 = vector.load %arg12[%c1_149, %c0_150, %c0_151] : memref<3x8x16xf32, #tpu.memory_space<vmem>>, vector<1x8x16xf32>
    %298 = vector.shape_cast %297 : vector<1x8x16xf32> to vector<8x16xf32>
    %cst_152 = arith.constant dense<0.000000e+00> : vector<16x16xf32>
    %299 = tpu.matmul %296, %298, %cst_152 {dimension_numbers = #tpu.dot_dimension_numbers<[1], [0], [0], [1], [0, 0, 1, 1], [], []>} : vector<16x8xf32>, vector<8x16xf32>, vector<16x16xf32> -> vector<16x16xf32>
    %300 = arith.addf %295, %299 : vector<16x16xf32>
    %301 = vector.extract_strided_slice %291 {offsets = [8, 0], sizes = [16, 8], strides = [1, 1]} : vector<24x8xf32> to vector<16x8xf32>
    %c2_153 = arith.constant 2 : index
    %c0_154 = arith.constant 0 : index
    %c0_155 = arith.constant 0 : index
    %302 = vector.load %arg12[%c2_153, %c0_154, %c0_155] : memref<3x8x16xf32, #tpu.memory_space<vmem>>, vector<1x8x16xf32>
    %303 = vector.shape_cast %302 : vector<1x8x16xf32> to vector<8x16xf32>
    %cst_156 = arith.constant dense<0.000000e+00> : vector<16x16xf32>
    %304 = tpu.matmul %301, %303, %cst_156 {dimension_numbers = #tpu.dot_dimension_numbers<[1], [0], [0], [1], [0, 0, 1, 1], [], []>} : vector<16x8xf32>, vector<8x16xf32>, vector<16x16xf32> -> vector<16x16xf32>
    %305 = arith.addf %300, %304 : vector<16x16xf32>
    %c0_157 = arith.constant 0 : index
    %c0_158 = arith.constant 0 : index
    %306 = vector.load %arg13[%c0_157, %c0_158] : memref<1x16xf32, #tpu.memory_space<vmem>>, vector<1x16xf32>
    %307 = vector.broadcast %306 : vector<1x16xf32> to vector<16x16xf32>
    %308 = arith.addf %305, %307 : vector<16x16xf32>
    %cst_159 = arith.constant 5.000000e-01 : f32
    %309 = vector.broadcast %cst_159 : f32 to vector<16x16xf32>
    %310 = arith.mulf %309, %308 : vector<16x16xf32>
    %cst_160 = arith.constant 0.707106769 : f32
    %311 = vector.broadcast %cst_160 : f32 to vector<16x16xf32>
    %312 = arith.mulf %308, %311 : vector<16x16xf32>
    %313 = math.absf %312 : vector<16x16xf32>
    %cst_161 = arith.constant 0.327591091 : f32
    %314 = vector.broadcast %cst_161 : f32 to vector<16x16xf32>
    %315 = arith.mulf %314, %313 : vector<16x16xf32>
    %cst_162 = arith.constant 1.000000e+00 : f32
    %316 = vector.broadcast %cst_162 : f32 to vector<16x16xf32>
    %317 = arith.addf %316, %315 : vector<16x16xf32>
    %cst_163 = arith.constant 1.000000e+00 : f32
    %318 = vector.broadcast %cst_163 : f32 to vector<16x16xf32>
    %319 = arith.divf %318, %317 : vector<16x16xf32>
    %cst_164 = arith.constant 1.06140542 : f32
    %320 = vector.broadcast %cst_164 : f32 to vector<16x16xf32>
    %321 = arith.mulf %320, %319 : vector<16x16xf32>
    %cst_165 = arith.constant -1.45315206 : f32
    %322 = vector.broadcast %cst_165 : f32 to vector<16x16xf32>
    %323 = arith.addf %321, %322 : vector<16x16xf32>
    %324 = arith.mulf %323, %319 : vector<16x16xf32>
    %cst_166 = arith.constant 1.42141378 : f32
    %325 = vector.broadcast %cst_166 : f32 to vector<16x16xf32>
    %326 = arith.addf %324, %325 : vector<16x16xf32>
    %327 = arith.mulf %326, %319 : vector<16x16xf32>
    %cst_167 = arith.constant -0.284496725 : f32
    %328 = vector.broadcast %cst_167 : f32 to vector<16x16xf32>
    %329 = arith.addf %327, %328 : vector<16x16xf32>
    %330 = arith.mulf %329, %319 : vector<16x16xf32>
    %cst_168 = arith.constant 0.254829586 : f32
    %331 = vector.broadcast %cst_168 : f32 to vector<16x16xf32>
    %332 = arith.addf %330, %331 : vector<16x16xf32>
    %333 = arith.mulf %332, %319 : vector<16x16xf32>
    %334 = arith.mulf %313, %313 : vector<16x16xf32>
    %cst_169 = arith.constant 0.000000e+00 : f32
    %335 = vector.broadcast %cst_169 : f32 to vector<16x16xf32>
    %336 = arith.subf %335, %334 : vector<16x16xf32>
    %337 = math.exp %336 : vector<16x16xf32>
    %338 = arith.mulf %333, %337 : vector<16x16xf32>
    %cst_170 = arith.constant 1.000000e+00 : f32
    %339 = vector.broadcast %cst_170 : f32 to vector<16x16xf32>
    %340 = arith.subf %339, %338 : vector<16x16xf32>
    %cst_171 = arith.constant 0.000000e+00 : f32
    %341 = vector.broadcast %cst_171 : f32 to vector<16x16xf32>
    %342 = arith.cmpf oge, %312, %341 : vector<16x16xf32>
    %cst_172 = arith.constant 0.000000e+00 : f32
    %343 = vector.broadcast %cst_172 : f32 to vector<16x16xf32>
    %344 = arith.subf %343, %340 : vector<16x16xf32>
    %345 = arith.select %342, %340, %344 : vector<16x16xi1>, vector<16x16xf32>
    %cst_173 = arith.constant 1.000000e+00 : f32
    %346 = vector.broadcast %cst_173 : f32 to vector<16x16xf32>
    %347 = arith.addf %346, %345 : vector<16x16xf32>
    %348 = arith.mulf %310, %347 : vector<16x16xf32>
    %cst_174 = arith.constant 0.000000e+00 : f32
    %349 = vector.broadcast %cst_174 : f32 to vector<4x16xf32>
    %350 = tpu.concatenate %349, %348, %349 in 0 : vector<4x16xf32>, vector<16x16xf32>, vector<4x16xf32> -> vector<24x16xf32>
    %351 = vector.extract_strided_slice %350 {offsets = [0, 0], sizes = [16, 16], strides = [1, 1]} : vector<24x16xf32> to vector<16x16xf32>
    %c0_175 = arith.constant 0 : index
    %c0_176 = arith.constant 0 : index
    %c0_177 = arith.constant 0 : index
    %352 = vector.load %arg14[%c0_175, %c0_176, %c0_177] : memref<3x16x16xf32, #tpu.memory_space<vmem>>, vector<1x16x16xf32>
    %353 = vector.shape_cast %352 : vector<1x16x16xf32> to vector<16x16xf32>
    %cst_178 = arith.constant dense<0.000000e+00> : vector<16x16xf32>
    %354 = tpu.matmul %351, %353, %cst_178 {dimension_numbers = #tpu.dot_dimension_numbers<[1], [0], [0], [1], [0, 0, 1, 1], [], []>} : vector<16x16xf32>, vector<16x16xf32>, vector<16x16xf32> -> vector<16x16xf32>
    %355 = vector.extract_strided_slice %350 {offsets = [4, 0], sizes = [16, 16], strides = [1, 1]} : vector<24x16xf32> to vector<16x16xf32>
    %c1_179 = arith.constant 1 : index
    %c0_180 = arith.constant 0 : index
    %c0_181 = arith.constant 0 : index
    %356 = vector.load %arg14[%c1_179, %c0_180, %c0_181] : memref<3x16x16xf32, #tpu.memory_space<vmem>>, vector<1x16x16xf32>
    %357 = vector.shape_cast %356 : vector<1x16x16xf32> to vector<16x16xf32>
    %cst_182 = arith.constant dense<0.000000e+00> : vector<16x16xf32>
    %358 = tpu.matmul %355, %357, %cst_182 {dimension_numbers = #tpu.dot_dimension_numbers<[1], [0], [0], [1], [0, 0, 1, 1], [], []>} : vector<16x16xf32>, vector<16x16xf32>, vector<16x16xf32> -> vector<16x16xf32>
    %359 = arith.addf %354, %358 : vector<16x16xf32>
    %360 = vector.extract_strided_slice %350 {offsets = [8, 0], sizes = [16, 16], strides = [1, 1]} : vector<24x16xf32> to vector<16x16xf32>
    %c2_183 = arith.constant 2 : index
    %c0_184 = arith.constant 0 : index
    %c0_185 = arith.constant 0 : index
    %361 = vector.load %arg14[%c2_183, %c0_184, %c0_185] : memref<3x16x16xf32, #tpu.memory_space<vmem>>, vector<1x16x16xf32>
    %362 = vector.shape_cast %361 : vector<1x16x16xf32> to vector<16x16xf32>
    %cst_186 = arith.constant dense<0.000000e+00> : vector<16x16xf32>
    %363 = tpu.matmul %360, %362, %cst_186 {dimension_numbers = #tpu.dot_dimension_numbers<[1], [0], [0], [1], [0, 0, 1, 1], [], []>} : vector<16x16xf32>, vector<16x16xf32>, vector<16x16xf32> -> vector<16x16xf32>
    %364 = arith.addf %359, %363 : vector<16x16xf32>
    %c0_187 = arith.constant 0 : index
    %c0_188 = arith.constant 0 : index
    %365 = vector.load %arg15[%c0_187, %c0_188] : memref<1x16xf32, #tpu.memory_space<vmem>>, vector<1x16xf32>
    %366 = vector.broadcast %365 : vector<1x16xf32> to vector<16x16xf32>
    %367 = arith.addf %364, %366 : vector<16x16xf32>
    %368 = arith.addf %367, %249 : vector<16x16xf32>
    %c0_189 = arith.constant 0 : index
    %c0_190 = arith.constant 0 : index
    %c0_191 = arith.constant 0 : index
    %369 = vector.load %arg18[%c0_189, %c0_190, %c0_191] : memref<1x16x16xf32, #tpu.memory_space<vmem>>, vector<1x16x16xf32>
    %370 = vector.shape_cast %369 : vector<1x16x16xf32> to vector<16x16xf32>
    %371 = vector.shape_cast %368 : vector<16x16xf32> to vector<1x16x16xf32>
    tpu.vector_store %arg18[%c0_189, %c0_190, %c0_191], %371 {strides = array<i32>} : memref<1x16x16xf32, #tpu.memory_space<vmem>>, vector<1x16x16xf32>,
    return
  }
  func.func @transform_0(%arg0: i32) -> (i32, i32, i32) {
    %c0_i32 = arith.constant 0 : i32
    %c0_i32_0 = arith.constant 0 : i32
    %c0_i32_1 = arith.constant 0 : i32
    return %arg0, %c0_i32, %c0_i32_0 : i32, i32, i32
  }
  func.func @transform_1(%arg0: i32) -> (i32, i32, i32) {
    %c0_i32 = arith.constant 0 : i32
    %c0_i32_0 = arith.constant 0 : i32
    %c0_i32_1 = arith.constant 0 : i32
    %c0_i32_2 = arith.constant 0 : i32
    return %c0_i32, %c0_i32_0, %c0_i32_1 : i32, i32, i32
  }
  func.func @transform_2(%arg0: i32) -> (i32, i32) {
    %c0_i32 = arith.constant 0 : i32
    %c0_i32_0 = arith.constant 0 : i32
    %c0_i32_1 = arith.constant 0 : i32
    return %c0_i32, %c0_i32_0 : i32, i32
  }
  func.func @transform_3(%arg0: i32) -> (i32, i32, i32) {
    %c0_i32 = arith.constant 0 : i32
    %c0_i32_0 = arith.constant 0 : i32
    %c0_i32_1 = arith.constant 0 : i32
    %c0_i32_2 = arith.constant 0 : i32
    return %c0_i32, %c0_i32_0, %c0_i32_1 : i32, i32, i32
  }
  func.func @transform_4(%arg0: i32) -> (i32, i32) {
    %c0_i32 = arith.constant 0 : i32
    %c0_i32_0 = arith.constant 0 : i32
    %c0_i32_1 = arith.constant 0 : i32
    return %c0_i32, %c0_i32_0 : i32, i32
  }
  func.func @transform_5(%arg0: i32) -> (i32, i32) {
    %c0_i32 = arith.constant 0 : i32
    %c0_i32_0 = arith.constant 0 : i32
    %c0_i32_1 = arith.constant 0 : i32
    return %c0_i32, %c0_i32_0 : i32, i32
  }
  func.func @transform_6(%arg0: i32) -> (i32, i32) {
    %c0_i32 = arith.constant 0 : i32
    %c0_i32_0 = arith.constant 0 : i32
    %c0_i32_1 = arith.constant 0 : i32
    return %c0_i32, %c0_i32_0 : i32, i32
  }
  func.func @transform_7(%arg0: i32) -> (i32, i32, i32) {
    %c0_i32 = arith.constant 0 : i32
    %c0_i32_0 = arith.constant 0 : i32
    %c0_i32_1 = arith.constant 0 : i32
    %c0_i32_2 = arith.constant 0 : i32
    return %c0_i32, %c0_i32_0, %c0_i32_1 : i32, i32, i32
  }
  func.func @transform_8(%arg0: i32) -> (i32, i32) {
    %c0_i32 = arith.constant 0 : i32
    %c0_i32_0 = arith.constant 0 : i32
    %c0_i32_1 = arith.constant 0 : i32
    return %c0_i32, %c0_i32_0 : i32, i32
  }
  func.func @transform_9(%arg0: i32) -> (i32, i32, i32) {
    %c0_i32 = arith.constant 0 : i32
    %c0_i32_0 = arith.constant 0 : i32
    %c0_i32_1 = arith.constant 0 : i32
    %c0_i32_2 = arith.constant 0 : i32
    return %c0_i32, %c0_i32_0, %c0_i32_1 : i32, i32, i32
  }
  func.func @transform_10(%arg0: i32) -> (i32, i32) {
    %c0_i32 = arith.constant 0 : i32
    %c0_i32_0 = arith.constant 0 : i32
    %c0_i32_1 = arith.constant 0 : i32
    return %c0_i32, %c0_i32_0 : i32, i32
  }
  func.func @transform_11(%arg0: i32) -> (i32, i32, i32) {
    %c0_i32 = arith.constant 0 : i32
    %c0_i32_0 = arith.constant 0 : i32
    %c0_i32_1 = arith.constant 0 : i32
    %c0_i32_2 = arith.constant 0 : i32
    return %c0_i32, %c0_i32_0, %c0_i32_1 : i32, i32, i32
  }
  func.func @transform_12(%arg0: i32) -> (i32, i32) {
    %c0_i32 = arith.constant 0 : i32
    %c0_i32_0 = arith.constant 0 : i32
    %c0_i32_1 = arith.constant 0 : i32
    return %c0_i32, %c0_i32_0 : i32, i32
  }
  func.func @transform_13(%arg0: i32) -> (i32, i32, i32) {
    %c0_i32 = arith.constant 0 : i32
    %c0_i32_0 = arith.constant 0 : i32
    %c0_i32_1 = arith.constant 0 : i32
    %c0_i32_2 = arith.constant 0 : i32
    return %c0_i32, %c0_i32_0, %c0_i32_1 : i32, i32, i32
  }
  func.func @transform_14(%arg0: i32) -> (i32, i32) {
    %c0_i32 = arith.constant 0 : i32
    %c0_i32_0 = arith.constant 0 : i32
    %c0_i32_1 = arith.constant 0 : i32
    return %c0_i32, %c0_i32_0 : i32, i32
  }
  func.func @transform_15(%arg0: i32) -> (i32, i32) {
    %c0_i32 = arith.constant 0 : i32
    %c0_i32_0 = arith.constant 0 : i32
    %c0_i32_1 = arith.constant 0 : i32
    return %c0_i32, %c0_i32_0 : i32, i32
  }
  func.func @transform_16(%arg0: i32) -> (i32, i32) {
    %c0_i32 = arith.constant 0 : i32
    %c0_i32_0 = arith.constant 0 : i32
    %c0_i32_1 = arith.constant 0 : i32
    return %c0_i32, %c0_i32_0 : i32, i32
  }
  func.func @transform_17(%arg0: i32) -> (i32, i32, i32) {
    %c0_i32 = arith.constant 0 : i32
    %c0_i32_0 = arith.constant 0 : i32
    %c0_i32_1 = arith.constant 0 : i32
    return %arg0, %c0_i32, %c0_i32_0 : i32, i32, i32
  }
}

</mosaic_0001>

<bundles_post_ra>
// kernel: tpu_custom_call.1
= control target key start
LH: loop header
LB: loop body
LE: loop exit
PB: predicated region body
PF: predicated region fallthrough
CT: control target
= control target key end

     0   :  { %s3465_s0 = inlined_call_operand.vmem [shape: f32[2,16,4], index: 0, kind: input, shape index: {}]   ;;  %s3466_s1 = inlined_call_operand.hbm [shape: f32[3,4,8], index: 1, kind: input, shape index: {}]   ;;  %s3467_s2 = inlined_call_operand.hbm [shape: f32[1,8], index: 2, kind: input, shape index: {}]   ;;  %s3468_s3 = inlined_call_operand.hbm [shape: f32[3,8,8], index: 3, kind: input, shape index: {}]   ;;  %s3469_s4 = inlined_call_operand.hbm [shape: f32[1,8], index: 4, kind: input, shape index: {}]   ;;  %s3470_s5 = inlined_call_operand.vmem [shape: f32[4,8], index: 5, kind: input, shape index: {}]   ;;  %s3471_s6 = inlined_call_operand.hbm [shape: f32[1,8], index: 6, kind: input, shape index: {}]   ;;  %s3472_s7 = inlined_call_operand.hbm [shape: f32[3,8,8], index: 7, kind: input, shape index: {}]   ;;  %s3473_s8 = inlined_call_operand.hbm [shape: f32[1,8], index: 8, kind: input, shape index: {}]   ;;  %s3474_s9 = inlined_call_operand.hbm [shape: f32[3,8,8], index: 9, kind: input, shape index: {}]   ;;  %s3475_s10 = inlined_call_operand.hbm [shape: f32[1,8], index: 10, kind: input, shape index: {}]   ;;  %s3476_s11 = inlined_call_operand.hbm [shape: f32[3,8,16], index: 11, kind: input, shape index: {}]   ;;  %s3477_s12 = inlined_call_operand.hbm [shape: f32[1,16], index: 12, kind: input, shape index: {}]   ;;  %s3478_s13 = inlined_call_operand.vmem [shape: f32[3,16,16], index: 13, kind: input, shape index: {}]   ;;  %s3479_s14 = inlined_call_operand.vmem [shape: f32[1,16], index: 14, kind: input, shape index: {}]   ;;  %s3480_s15 = inlined_call_operand.hbm [shape: f32[8,16], index: 15, kind: input, shape index: {}]   ;;  %s3481_s16 = inlined_call_operand.vmem [shape: f32[1,16], index: 16, kind: input, shape index: {}]   ;;  %s3482_s17 = inlined_call_operand.hbm [shape: f32[2,16,16], index: 17, kind: output, shape index: {}]  }
   0x1   :  { %3492 = sst [smem:[#allocation38_spill]] %s3465_s0 }
   0x2   :  { %3493 = sst [smem:[#allocation39_spill]] %s3466_s1 }
   0x3   :  { %3494 = sst [smem:[#allocation40_spill]] %s3467_s2 }
   0x4   :  { %3495 = sst [smem:[#allocation41_spill]] %s3469_s4 }
   0x5   :  { %3496 = sst [smem:[#allocation42_spill]] %s3472_s7 }
   0x6   :  { %3497 = sst [smem:[#allocation43_spill]] %s3474_s9 }
   0x7   :  { %3498 = sst [smem:[#allocation44_spill]] %s3482_s17 }
   0x8   :  { %22 = vsyncpa [#allocation3], 0 }
   0x9   :  { %23 = vsyncpa [#allocation6], 0 }
   0xa   :  { %24 = vsyncpa [#allocation9], 0 }
   0xb   :  { %25 = vsyncpa [#allocation12], 0 }
   0xc   :  { %26 = vsyncpa [#allocation15], 0 }
   0xd   :  { %27 = vsyncpa [#allocation18], 0 }
   0xe   :  { %28 = vsyncpa [#allocation21], 0 }
   0xf   :  { %29 = vsyncpa [#allocation4], 0 }
  0x10   :  { %31 = vsyncpa [#allocation4 + $0x1], 0  ;;  %s3052_s24 = smov 0   ;;  %s3054_s25 = smov 0  }
  0x11   :  { %s3056_s26 = smov 0   ;;  %s3058_s27 = smov 0  }
  0x12 LB: > { %3499 = sst [smem:[#allocation31_spill]] %s2930_s24  ;;  %s3073_s28 = sadd.s32 4294967295, %s2942_s27   ;;  %s2942_s27 = sphi %s3058_s27, %s3521_s27   ;;  %s2938_s26 = sphi %s3056_s26, %s3523_s26   ;;  %s2934_s25 = sphi %s3054_s25, %s3525_s25   ;;  %s2930_s24 = sphi %s3052_s24, %s3524_s24  }
  0x13   : > { %3500 = sst [smem:[#allocation32_spill]] %s2938_s26  ;;  %s2184_s29 = sadd.s32 4294967294, %s2942_s27  }
  0x14   : > { %3501 = sst [smem:[#allocation33_spill]] %s2942_s27  ;;  %s3077_s0 = sadd.s32 1, %s2942_s27  }
  0x15   : > { %3502 = sst [smem:[#allocation34_spill]] %s3077_s0  ;;  %s406_s30 = sadd.s32 1, %s2938_s26 }
  0x16   : > { %s403_s18 = ssub.s32 %s2942_s27, %s3077_s0  ;;  %p416_p0 = scmp.ne.s32.totalorder %s2938_s26, %s2934_s25 }
  0x17   : > { %p404_p1 = scmp.eq.s32.totalorder %s403_s18, 0  ;;  %p417_p2 = scmp.eq.s32.totalorder %s3073_s28, 1 }
  0x18   : > { %p422_p3 = scmp.ne.s32.totalorder %s2934_s25, %s2930_s24  ;;  %p423_p4 = scmp.eq.s32.totalorder %s2184_s29, 1 }
  0x19   : > { %s3088_s19 = scalar_select %p404_p1, %s2938_s26, %s406_s30  }
  0x1a   : > { %p3090_p5 = por %p417_p2, %p416_p0  ;;  %p3094_p6 = por %p423_p4, %p422_p3 }
  0x1b   : > { %3503 = sst [smem:[#allocation35_spill]] %s3088_s19  ;;  %p2185_p7 = scmp.ge.s32.totalorder %s2942_s27, 1 }
  0x1c   : > { %s3504_s1 = scalar_select %p3090_p5, 1, 0 }
  0x1d   : > { %s3506_s20 = scalar_select %p3094_p6, 1, 0 }
  0x1e   : > { %3505 = sst [smem:[#allocation36_spill]] %s3504_s1  ;;  %p430_p8 = scmp.lt.s32.totalorder %s2942_s27, 3 }
  0x1f   : > { %3507 = sst [smem:[#allocation37_spill]] %s3506_s20  ;;  %p2361_p9 = scmp.eq.s32.totalorder %s3073_s28, 0 }
  0x20   : > { %p3101_p10 = pnand %p2185_p7, %p430_p8  ;;  %s3509_s2 = sld [smem:[#allocation40_spill]] }
  0x21   : > { %s2944_s30 = smov [#allocation5]   ;;  %s3510_s4 = sld [smem:[#allocation41_spill]] }
  0x22   : > { %p2320_p11 = pneg %p3101_p10  ;;  %s458_s18 = sshll.u32 %s2944_s30, 4  ;;  %s459_s18 = int_to_ptr.vmem [resolvable:$true] %s458_s18 }
  0x23   : > { %s2945_s22 = smov [#allocation8]   ;;  %s3512_s7 = sld [smem:[#allocation42_spill]] }
  0x24   : > { %p3115_p12 = pnand %p2361_p9, %p2320_p11  ;;  %s484_s23 = sshll.u32 %s2945_s22, 4  ;;  %s485_s23 = int_to_ptr.vmem [resolvable:$true] %s484_s23 }
  0x25   : > { %s2946_s19 = smov [#allocation11]   ;;  %s3513_s9 = sld [smem:[#allocation43_spill]] }
  0x26   : > { %s456_s29 = sshll.u32 %s3509_s2, 4  ;;  %s2947_s22 = smov 128   ;;  %s457_s29 = int_to_ptr.hbm [resolvable:$true] %s456_s29 }
  0x27   : > { %s482_s0 = sshll.u32 %s3510_s4, 4  ;;  %s510_s4 = sshll.u32 %s2946_s19, 4  ;;  %s483_s0 = int_to_ptr.hbm [resolvable:$true] %s482_s0  ;;  %s511_s4 = int_to_ptr.vmem [resolvable:$true] %s510_s4 }
  0x28   : > { %2326 = dma.hbm_to_vmem [thread:$0]  (!%p3115_p12), %s457_s29, 16, %s459_s18, [#allocation6]  }
  0x29   : > { %2332 = dma.hbm_to_vmem [thread:$0]  (!%p3115_p12), %s483_s0, 16, %s485_s23, [#allocation9]  }
  0x2a   : > { %s508_s26 = sshll.u32 %s3512_s7, 4  ;;  %s2948_s17 = smov 8   ;;  %s509_s26 = int_to_ptr.hbm [resolvable:$true] %s508_s26 }
  0x2b   : > { %s534_s1 = sshll.u32 %s3513_s9, 4  ;;  %s2949_s2 = smov [#allocation14]   ;;  %s535_s1 = int_to_ptr.hbm [resolvable:$true] %s534_s1 }
  0x2c   : > { %2338 = dma.hbm_to_vmem [thread:$0]  (!%p3115_p12), %s509_s26, 384, %s511_s4, [#allocation12], %s2947_s22, %s2947_s22, %s2948_s17  }
  0x2d   : > { %s536_s0 = sshll.u32 %s2949_s2, 4  ;;  %s560_s23 = sshll.u32 %s3476_s11, 4  ;;  %s537_s0 = int_to_ptr.vmem [resolvable:$true] %s536_s0  ;;  %s561_s23 = int_to_ptr.hbm [resolvable:$true] %s560_s23 }
  0x2e   : > { %2344 = dma.hbm_to_vmem [thread:$0]  (!%p3115_p12), %s535_s1, 384, %s537_s0, [#allocation15], %s2947_s22, %s2947_s22, %s2948_s17  }
  0x2f   : > { %s3514_s30 = sld [smem:[#allocation39_spill]]  ;;  %s2950_s4 = smov [#allocation17]  }
  0x30   : > { %s562_s26 = sshll.u32 %s2950_s4, 4  ;;  %s2951_s2 = smov [#allocation2]   ;;  %s563_s26 = int_to_ptr.vmem [resolvable:$true] %s562_s26 }
  0x31   : > { %2350 = dma.hbm_to_vmem [thread:$0]  (!%p3115_p12), %s561_s23, 384, %s563_s26, [#allocation18], %s2947_s22, %s2947_s22, %s2948_s17  }
  0x32   : > { %s443_s29 = sshll.u32 %s2951_s2, 4  ;;  %s2952_s18 = smov 64   ;;  %s444_s29 = int_to_ptr.vmem [resolvable:$true] %s443_s29 }
  0x33   : > { %s2953_s1 = smov 4   ;;  %s467_s27 = sshll.u32 %s3468_s3, 4  ;;  %s468_s27 = int_to_ptr.hbm [resolvable:$true] %s467_s27 }
  0x34   : > { %s497_s23 = sshll.u32 %s3471_s6, 4  ;;  %s549_s9 = sshll.u32 %s3475_s10, 4  ;;  %s498_s23 = int_to_ptr.hbm [resolvable:$true] %s497_s23  ;;  %s550_s9 = int_to_ptr.hbm [resolvable:$true] %s549_s9 }
  0x35   : > { %s441_s19 = sshll.u32 %s3514_s30, 4  ;;  %s2954_s30 = smov [#allocation7]   ;;  %s442_s19 = int_to_ptr.hbm [resolvable:$true] %s441_s19 }
  0x36   : > { %2323 = dma.hbm_to_vmem [thread:$0]  (!%p3115_p12), %s442_s19, 192, %s444_s29, [#allocation3], %s2952_s18, %s2952_s18, %s2953_s1  }
  0x37   : > { %s469_s4 = sshll.u32 %s2954_s30, 4  ;;  %s2955_s19 = smov [#allocation10]   ;;  %s470_s4 = int_to_ptr.vmem [resolvable:$true] %s469_s4 }
  0x38   : > { %2329 = dma.hbm_to_vmem [thread:$0]  (!%p3115_p12), %s468_s27, 384, %s470_s4, [#allocation6], %s2947_s22, %s2947_s22, %s2948_s17  }
  0x39   : > { %s499_s26 = sshll.u32 %s2955_s19, 4  ;;  %s523_s18 = sshll.u32 %s3473_s8, 4  ;;  %s500_s26 = int_to_ptr.vmem [resolvable:$true] %s499_s26  ;;  %s524_s18 = int_to_ptr.hbm [resolvable:$true] %s523_s18 }
  0x3a   : > { %2335 = dma.hbm_to_vmem [thread:$0]  (!%p3115_p12), %s498_s23, 16, %s500_s26, [#allocation9]  }
  0x3b   : > { %s2956_s0 = smov [#allocation13]   ;;  %s2957_s17 = smov [#allocation16]  }
  0x3c   : > { %s525_s24 = sshll.u32 %s2956_s0, 4  ;;  %s551_s22 = sshll.u32 %s2957_s17, 4  ;;  %s526_s24 = int_to_ptr.vmem [resolvable:$true] %s525_s24  ;;  %s552_s22 = int_to_ptr.vmem [resolvable:$true] %s551_s22 }
  0x3d   : > { %2341 = dma.hbm_to_vmem [thread:$0]  (!%p3115_p12), %s524_s18, 16, %s526_s24, [#allocation12]  }
  0x3e   : > { %s575_s4 = sshll.u32 %s3477_s12, 4  ;;  %s593_s26 = sshll.u32 %s3480_s15, 4  ;;  %s576_s4 = int_to_ptr.hbm [resolvable:$true] %s575_s4  ;;  %s594_s26 = int_to_ptr.hbm [resolvable:$true] %s593_s26 }
  0x3f   : > { %2347 = dma.hbm_to_vmem [thread:$0]  (!%p3115_p12), %s550_s9, 16, %s552_s22, [#allocation15]  }
  0x40   : > { %s2958_s2 = smov [#allocation19]   ;;  %s2959_s18 = smov [#allocation20]  }
  0x41   : > { %s577_s29 = sshll.u32 %s2958_s2, 4  ;;  %s595_s1 = sshll.u32 %s2959_s18, 4  ;;  %s578_s29 = int_to_ptr.vmem [resolvable:$true] %s577_s29  ;;  %s596_s1 = int_to_ptr.vmem [resolvable:$true] %s595_s1 }
  0x42   : > { %2353 = dma.hbm_to_vmem [thread:$0]  (!%p3115_p12), %s576_s4, 16, %s578_s29, [#allocation18]  }
  0x43   : > { %2356 = dma.hbm_to_vmem [thread:$0]  (!%p3115_p12), %s594_s26, 128, %s596_s1, [#allocation21]  }
  0x44   : > { %619 = sbr.rel (%p3101_p10) target bundleno = 1332 (0x534), region = 88 }
  0x49   : > { %2897 = dma.done.wait (%p2361_p9), [#allocation3], 192  }
  0x4a   : > { %2899 = vsyncadd (%p2361_p9), [#allocation3], 4294967104 }
  0x4b   : > { %2901 = dma.done.wait (%p2361_p9), [#allocation6], 400  }
  0x4c   : > { %2903 = vsyncadd (%p2361_p9), [#allocation6], 4294966896 }
  0x4d   : > { %2905 = dma.done.wait (%p2361_p9), [#allocation9], 32  }
  0x4e   : > { %2907 = vsyncadd (%p2361_p9), [#allocation9], 4294967264 }
  0x4f   : > { %2909 = dma.done.wait (%p2361_p9), [#allocation12], 400  }
  0x50   : > { %2911 = vsyncadd (%p2361_p9), [#allocation12], 4294966896 }
  0x51   : > { %2913 = dma.done.wait (%p2361_p9), [#allocation15], 400  }
  0x52   : > { %2915 = vsyncadd (%p2361_p9), [#allocation15], 4294966896 }
  0x53   : > { %2917 = dma.done.wait (%p2361_p9), [#allocation18], 400  }
  0x54   : > { %2919 = vsyncadd (%p2361_p9), [#allocation18], 4294966896 }
  0x55   : > { %2921 = dma.done.wait (%p2361_p9), [#allocation21], 128  }
  0x56   : > { %2923 = vsyncadd (%p2361_p9), [#allocation21], 4294967168  ;;  %p727_p13 = scmp.lt.s32.totalorder %s3073_s28, 1  ;;  %vm746_vm0 = vcmask 1043456   ;;  %s3515_s0 = sld [smem:[#allocation38_spill]]  ;;  %vm855_vm11 = vcmask 1040384  }
  0x57   : > { %v863_v0 = vld [vmem:[#allocation2] sm:$0xf]  ;;  %v935_v34 = vld [vmem:[#allocation2 + $0x8] sm:$0xf]  ;;  %v865_v41 = vld [vmem:[#allocation2 + $0x4] sm:$0xf] }
  0x58   : > { %s728_s20 = scalar_select %p727_p13, %s3073_s28, 1  ;;  %2221 = vmatpush.msk.msra.mxu2 %vm746_vm0, %v863_v0  ;;  %2224 = vmatpush.msk.msra.mxu3 %vm746_vm0, %v935_v34  ;;  %vm739_vm12 = vcmask 31744   ;;  %vm936_vm13 = vcmask 1045504   ;;  %vm868_vm14 = vcmask 1046528  }
  0x59   : > { %2218 = vmatpush.msk.msra.mxu1 %vm746_vm0, %v865_v41  ;;  %s724_s7 = sand.u32 1, %s2934_s25   ;;  %s2269_s27 = sshll.u32 %s3073_s28, 4 }
  0x5a   : > { %s2268_s21 = sshll.u32 %s728_s20, 4  ;;  %s2212_s22 = sshll.u32 %s724_s7, 4 }
  0x5b   : > { %s3516_s23 = sld [smem:[#allocation44_spill]]  ;;  %s726_s26 = scalar_lea.vmem [#allocation22], %s2212_s22 }
  0x5c   : > { %s731_s24 = scalar_lea.vmem %s3515_s0, %s2268_s21  ;;  %s2002_s29 = sshll.u32 %s726_s26, 4  ;;  %s2003_s29 = int_to_ptr.vmem [resolvable:$true] %s2002_s29 }
  0x5d   : > { %v3220_v1 = vld [vmem:[%s731_s24] sm:$0xff]  ;;  %v3222_v2 = vld [vmem:[%s731_s24 + $0x8] sm:$0xff]  ;;  %s1990_s28 = scalar_lea.sflag [#allocation4], %s724_s7 }
  0x5e   : > { %v3226_v3 = vmul.f32 0.70710677, %v3220_v1  ;;  %v3229_v4 = vmul.f32 0.70710677, %v3222_v2  ;;  %v773_v0 = vmul.f32 0.5, %v3220_v1 }
  0x60   : > { %v777_v5 = vand.u32 2147483647, %v3226_v3  ;;  %v778_v6 = vand.u32 2147483647, %v3229_v4  ;;  %vm843_vm9 = vcmp.ge.f32.partialorder %v3226_v3, 0.0  ;;  %vm844_vm10 = vcmp.ge.f32.partialorder %v3229_v4, 0.0 }
  0x61   : > { %s2001_s19 = scalar_lea.hbm %s3516_s23, %s2269_s27  ;;  %s2872_s0 = scalar_lea.hbm %s3516_s23, 32 }
  0x62   : > { %v779_v7 = vmul.f32 0.3275911, %v777_v5  ;;  %v780_v8 = vmul.f32 0.3275911, %v778_v6  ;;  %v831_v27 = vmul.f32 %v777_v5, %v777_v5  ;;  %v832_v29 = vmul.f32 %v778_v6, %v778_v6  ;;  %s2004_s18 = sshll.u32 %s2001_s19, 4  ;;  %s2005_s18 = int_to_ptr.hbm [resolvable:$true] %s2004_s18 }
  0x63   : > { %v774_v6 = vmul.f32 0.5, %v3222_v2  ;;  %s2866_s1 = sshra.s32 %s2005_s18, 4  ;;  %s2867_s1 = int_to_ptr.hbm [resolvable:$true] %s2866_s1 }
  0x64   : > { %v781_v9 = vadd.f32 1.0, %v779_v7  ;;  %v782_v10 = vadd.f32 1.0, %v780_v8  ;;  %v833_v36 = vsub.f32 0.0, %v831_v27  ;;  %v834_v38 = vsub.f32 0.0, %v832_v29  ;;  %v2436_v29 = vld [vmem:[#allocation5] ss:$0 sm:$0xff]  ;;  %p2873_p3 = scmp.lt.s32.totalorder %s2867_s1, %s3516_s23 }
  0x65   : > { %s2868_s20 = scalar_lea.hbm %s2867_s1, 16 }
  0x66   : > { %2444 = vrcp.f32 %v781_v9  ;;  %vm788_vm1 = vweird.f32 %v781_v9  ;;  %v794_v14 = vand.u32 2147483648, %v781_v9  ;;  %v792_v17 = vand.u32 2147483647, %v781_v9  ;;  %p2869_p0 = scmp.ne.s32.totalorder %s2867_s1, %s2868_s20  ;;  %p2874_p4 = scmp.lt.s32.totalorder %s2872_s0, %s2868_s20 }
  0x67   : > { %2446 = vrcp.f32 %v782_v10  ;;  %v809_v18 = vand.u32 2147483648, %v782_v10  ;;  %vm803_vm3 = vweird.f32 %v782_v10  ;;  %v807_v20 = vand.u32 2147483647, %v782_v10 }
  0x68   : > { %v795_v22 = vor.u32 1.1754944e-38, %v794_v14  ;;  %vm793_vm6 = vcmp.eq.f32.partialorder %v792_v17, 8.507059e+37  ;;  %v835_v43 = vmul.f32 1.442695, %v833_v36  ;;  %v837_v45 = vmul.f32 1.442695, %v834_v38  ;;  %p2870_p1 = pnand %p2869_p0, %p3090_p5  ;;  %p2875_p7 = por %p2874_p4, %p2873_p3 }
  0x69   : > { %v810_v25 = vor.u32 1.1754944e-38, %v809_v18  ;;  %vm808_vm8 = vcmp.eq.f32.partialorder %v807_v20, 8.507059e+37 }
  0x6a   : > { %2448 = vpow2.f32 %v835_v43  ;;  %p2871_p2 = pneg %p2870_p1 }
  0x6b   : > { %2450 = vpow2.f32 %v837_v45 }
  0x6c   : > { %v2445_v11 = vpop.eup %2444  ;;  %p2876_p8 = pnand %p2875_p7, %p2871_p2 }
  0x6d   : > { %v2447_v12 = vpop.eup %2446  ;;  %v784_v13 = vmul.f32 %v2445_v11, %v781_v9  ;;  %vm789_vm2 = vweird.f32 %v2445_v11 }
  0x6e   : > { %v799_v15 = vmul.f32 %v2447_v12, %v782_v10  ;;  %vm804_vm4 = vweird.f32 %v2447_v12  ;;  %vm790_vm5 = vmor %vm788_vm1, %vm789_vm2 }
  0x6f   : > { %v785_v16 = vsub.f32 1.0, %v784_v13  ;;  %vm805_vm7 = vmor %vm803_vm3, %vm804_vm4 }
  0x70   : > { %v800_v19 = vsub.f32 1.0, %v799_v15  ;;  %v2449_v54 = vpop.eup %2448 }
  0x71   : > { %v786_v21 = vmul.f32 %v2445_v11, %v785_v16  ;;  %v2451_v56 = vpop.eup %2450 }
  0x72   : > { %v801_v23 = vmul.f32 %v2447_v12, %v800_v19 }
  0x73   : > { %v787_v24 = vadd.f32 %v2445_v11, %v786_v21 }
  0x74   : > { %v802_v26 = vadd.f32 %v2447_v12, %v801_v23 }
  0x75   : > { %v791_v28 = vsel %vm790_vm5, %v2445_v11, %v787_v24 }
  0x76   : > { %v796_v30 = vsel %vm793_vm6, %v795_v22, %v791_v28  ;;  %v806_v31 = vsel %vm805_vm7, %v2447_v12, %v802_v26 }
  0x77   : > { %v811_v32 = vsel %vm808_vm8, %v810_v25, %v806_v31  ;;  %v813_v33 = vmul.f32 1.0614054, %v796_v30 }
  0x78   : > { %v814_v35 = vmul.f32 1.0614054, %v811_v32 }
  0x79   : > { %v815_v37 = vadd.f32 -1.4531521, %v813_v33 }
  0x7a   : > { %v816_v39 = vadd.f32 -1.4531521, %v814_v35 }
  0x7b   : > { %v817_v40 = vmul.f32 %v815_v37, %v796_v30 }
  0x7c   : > { %v818_v42 = vmul.f32 %v816_v39, %v811_v32 }
  0x7d   : > { %v819_v44 = vadd.f32 1.4214138, %v817_v40 }
  0x7e   : > { %v820_v46 = vadd.f32 1.4214138, %v818_v42 }
  0x7f   : > { %v821_v47 = vmul.f32 %v819_v44, %v796_v30 }
  0x80   : > { %v822_v48 = vmul.f32 %v820_v46, %v811_v32 }
  0x81   : > { %v823_v49 = vadd.f32 -0.28449672, %v821_v47 }
  0x82   : > { %v824_v50 = vadd.f32 -0.28449672, %v822_v48 }
  0x83   : > { %v825_v51 = vmul.f32 %v823_v49, %v796_v30 }
  0x84   : > { %v826_v52 = vmul.f32 %v824_v50, %v811_v32 }
  0x85   : > { %v827_v53 = vadd.f32 0.2548296, %v825_v51 }
  0x86   : > { %v828_v55 = vadd.f32 0.2548296, %v826_v52 }
  0x87   : > { %v829_v57 = vmul.f32 %v827_v53, %v796_v30  ;;  %v734_v53 = vld [vmem:[%s3470_s5] sm:$0xf] }
  0x88   : > { %v830_v58 = vmul.f32 %v828_v55, %v811_v32  ;;  %2215 = vmatpush.msk.msra.mxu0 %vm746_vm0, %v734_v53 }
  0x89   : > { %v839_v59 = vmul.f32 %v2449_v54, %v829_v57  ;;  %2216 = vmatmul.msk.f32.vlgmr.msra.gmra.mxu0 %vm739_vm12, %v3220_v1 }
  0x8a   : > { %v840_v60 = vmul.f32 %v2451_v56, %v830_v58 }
  0x8b   : > { %v841_v61 = vsub.f32 1.0, %v839_v59 }
  0x8c   : > { %v842_v62 = vsub.f32 1.0, %v840_v60 }
  0x8d   : > { %v845_v63 = vsub.f32 0.0, %v841_v61 }
  0x8e   : > { %v846_v5 = vsub.f32 0.0, %v842_v62 }
  0x8f   : > { %v847_v7 = vsel %vm843_vm9, %v841_v61, %v845_v63  ;;  %v1069_v61 = vld [vmem:[#allocation7] sm:$0xff]  ;;  %vm1079_vm9 = vcmask 64512  }
  0x90   : > { %v848_v8 = vsel %vm844_vm10, %v842_v62, %v846_v5  ;;  %v849_v9 = vadd.f32 1.0, %v847_v7  ;;  %1126 = vmatpush.msrb.mxu1 %v1069_v61 }
  0x91   : > { %v850_v10 = vadd.f32 1.0, %v848_v8  ;;  %2217 = vmatmul.msk.f32.gmra.mxu0 %vm739_vm12, %v3222_v2 }
  0x92   : > { %v851_v11 = vmul.f32 %v849_v9, %v773_v0  ;;  %v1135_v9 = vld [vmem:[#allocation7 + $0x10] sm:$0xff] }
  0x93   : > { %v852_v12 = vmul.f32 %v850_v10, %v774_v6  ;;  %v1071_v10 = vld [vmem:[#allocation7 + $0x8] sm:$0xff]  ;;  %1160 = vmatpush.msrb.mxu2 %v1135_v9 }
  0x94   : > { %v856_v13 = vrot.slane %v851_v11, 7  ;;  %1099 = vmatpush.msrb.mxu0 %v1071_v10 }
  0x95   : > { %v857_v14 = vrot.slane %v852_v12, 7 }
  0x96   : > { %v861_v3 = vsel %vm855_vm11, 0.0, %v856_v13 }
  0x97   : > { %v858_v4 = vsel %vm855_vm11, %v856_v13, %v857_v14  ;;  %v869_v15 = vrot.slane %v861_v3, 1  ;;  %2222 = vmatmul.msk.f32.vlgmr.msra.gmra.mxu2 %vm739_vm12, %v861_v3  ;;  %v937_v16 = vrot.slane %v861_v3, 2  ;;  %v862_v19 = vsel %vm855_vm11, %v857_v14, 0.0 }
  0x98   : > { %v938_v17 = vrot.slane %v858_v4, 2  ;;  %v870_v18 = vrot.slane %v858_v4, 1  ;;  %v940_v22 = vrot.slane %v862_v19, 2  ;;  %v872_v23 = vrot.slane %v862_v19, 1 }
  0x9a   : > { %v939_v20 = vsel %vm936_vm13, %v937_v16, %v938_v17  ;;  %v871_v21 = vsel %vm868_vm14, %v869_v15, %v870_v18  ;;  %v941_v24 = vsel %vm936_vm13, %v938_v17, %v940_v22  ;;  %v873_v25 = vsel %vm868_vm14, %v870_v18, %v872_v23 }
  0x9b   : > { %2225 = vmatmul.msk.f32.vlgmr.msra.gmra.mxu3 %vm739_vm12, %v939_v20  ;;  %2219 = vmatmul.msk.f32.vlgmr.msra.gmra.mxu1 %vm739_vm12, %v871_v21 }
  0x9f   : > { %2223 = vmatmul.msk.f32.gmra.mxu2 %vm739_vm12, %v858_v4 }
  0xa3   : > { %2226 = vmatmul.msk.f32.gmra.mxu3 %vm739_vm12, %v941_v24  ;;  %2220 = vmatmul.msk.f32.gmra.mxu1 %vm739_vm12, %v873_v25 }
 0x118   : > { %v898_v26 = vpop.f32.mrf.mxu1 }
 0x11a   : > { %v928_v27 = vpop.f32.mrf.mxu2 }
 0x11b   : > { %v929_v28 = vadd.f32 %v928_v27, %v898_v26 }
 0x11e   : > { %v966_v30 = vpop.f32.mrf.mxu3 }
 0x11f   : > { %v972_v31 = vadd.f32 %v966_v30, %v929_v28 }
 0x120   : > { %v901_v32 = vpop.f32.mrf.mxu1 }
 0x121   : > { %v3252_v33 = vadd.f32 %v2436_v29, %v972_v31 }
 0x122   : > { %v931_v34 = vpop.f32.mrf.mxu2 }
 0x123   : > { %v3255_v35 = vmul.f32 0.70710677, %v3252_v33  ;;  %v932_v36 = vadd.f32 %v931_v34, %v901_v32 }
 0x125   : > { %v984_v37 = vand.u32 2147483647, %v3255_v35  ;;  %vm1050_vm8 = vcmp.ge.f32.partialorder %v3255_v35, 0.0 }
 0x126   : > { %v969_v38 = vpop.f32.mrf.mxu3 }
 0x127   : > { %v986_v39 = vmul.f32 0.3275911, %v984_v37  ;;  %v973_v40 = vadd.f32 %v969_v38, %v932_v36  ;;  %v1038_v58 = vmul.f32 %v984_v37, %v984_v37  ;;  %v980_v37 = vmul.f32 0.5, %v3252_v33 }
 0x129   : > { %v988_v41 = vadd.f32 1.0, %v986_v39  ;;  %v3258_v42 = vadd.f32 %v2436_v29, %v973_v40  ;;  %v1040_v6 = vsub.f32 0.0, %v1038_v58 }
 0x12b   : > { %2452 = vrcp.f32 %v988_v41  ;;  %v3261_v43 = vmul.f32 0.70710677, %v3258_v42  ;;  %v1001_v50 = vand.u32 2147483648, %v988_v41  ;;  %v999_v52 = vand.u32 2147483647, %v988_v41 }
 0x12c   : > { %vm995_vm1 = vweird.f32 %v988_v41  ;;  %v1042_v14 = vmul.f32 1.442695, %v1040_v6  ;;  %v2437_v6 = vld [vmem:[#allocation10] ss:$0 sm:$0xff] }
 0x12d   : > { %v985_v44 = vand.u32 2147483647, %v3261_v43  ;;  %v1002_v55 = vor.u32 1.1754944e-38, %v1001_v50  ;;  %vm1000_vm3 = vcmp.eq.f32.partialorder %v999_v52, 8.507059e+37  ;;  %vm1051_vm10 = vcmp.ge.f32.partialorder %v3261_v43, 0.0 }
 0x12f   : > { %v987_v45 = vmul.f32 0.3275911, %v985_v44  ;;  %v1039_v15 = vmul.f32 %v985_v44, %v985_v44 }
 0x131   : > { %v2453_v46 = vpop.eup %2452  ;;  %v989_v48 = vadd.f32 1.0, %v987_v45  ;;  %v1041_v20 = vsub.f32 0.0, %v1039_v15 }
 0x132   : > { %v991_v47 = vmul.f32 %v2453_v46, %v988_v41  ;;  %vm996_vm15 = vweird.f32 %v2453_v46 }
 0x133   : > { %2454 = vrcp.f32 %v989_v48  ;;  %vm997_vm2 = vmor %vm995_vm1, %vm996_vm15  ;;  %v1016_v0 = vand.u32 2147483648, %v989_v48  ;;  %v1014_v8 = vand.u32 2147483647, %v989_v48  ;;  %vm1010_vm5 = vweird.f32 %v989_v48 }
 0x134   : > { %v992_v49 = vsub.f32 1.0, %v991_v47  ;;  %2456 = vpow2.f32 %v1042_v14  ;;  %v1044_v25 = vmul.f32 1.442695, %v1041_v20 }
 0x135   : > { %v1017_v12 = vor.u32 1.1754944e-38, %v1016_v0  ;;  %vm1015_vm7 = vcmp.eq.f32.partialorder %v1014_v8, 8.507059e+37  ;;  %v2438_v8 = vld [vmem:[#allocation8] ss:$0 sm:$0xff] }
 0x136   : > { %v993_v51 = vmul.f32 %v2453_v46, %v992_v49  ;;  %2458 = vpow2.f32 %v1044_v25  ;;  %v981_v49 = vmul.f32 0.5, %v3258_v42 }
 0x138   : > { %v994_v54 = vadd.f32 %v2453_v46, %v993_v51 }
 0x139   : > { %v2455_v56 = vpop.eup %2454 }
 0x13a   : > { %v998_v57 = vsel %vm997_vm2, %v2453_v46, %v994_v54  ;;  %v1006_v59 = vmul.f32 %v2455_v56, %v989_v48  ;;  %vm1011_vm4 = vweird.f32 %v2455_v56  ;;  %v2457_v27 = vpop.eup %2456 }
 0x13b   : > { %v1003_v60 = vsel %vm1000_vm3, %v1002_v55, %v998_v57  ;;  %vm1012_vm6 = vmor %vm1010_vm5, %vm1011_vm4 }
 0x13c   : > { %v1020_v62 = vmul.f32 1.0614054, %v1003_v60  ;;  %v1007_v63 = vsub.f32 1.0, %v1006_v59  ;;  %v2459_v40 = vpop.eup %2458 }
 0x13e   : > { %v1022_v5 = vadd.f32 -1.4531521, %v1020_v62  ;;  %v1008_v7 = vmul.f32 %v2455_v56, %v1007_v63  ;;  %v767_v62 = vpop.f32.mrf.mxu0 }
 0x140   : > { %v1024_v11 = vmul.f32 %v1022_v5, %v1003_v60  ;;  %v1009_v1 = vadd.f32 %v2455_v56, %v1008_v7 }
 0x142   : > { %v1026_v13 = vadd.f32 1.4214138, %v1024_v11  ;;  %v1013_v3 = vsel %vm1012_vm6, %v2455_v56, %v1009_v1  ;;  %v768_v11 = vadd.f32 %v2437_v6, %v767_v62  ;;  %vm1260_vm6 = vcmask 1041408  }
 0x143   : > { %v1018_v4 = vsel %vm1015_vm7, %v1017_v12, %v1013_v3  ;;  %v1270_v12 = vld [vmem:[#allocation11 + $0x8] sm:$0xff] }
 0x144   : > { %v1028_v16 = vmul.f32 %v1026_v13, %v1003_v60  ;;  %v1021_v17 = vmul.f32 1.0614054, %v1018_v4  ;;  %v1268_v13 = vld [vmem:[#allocation11] sm:$0xff]  ;;  %1297 = vmatpush.msrb.mxu3 %v1270_v12 }
 0x145   : > { %1324 = vmatpush.msra.mxu0 %v1268_v13 }
 0x146   : > { %v1030_v18 = vadd.f32 -0.28449672, %v1028_v16  ;;  %v1023_v19 = vadd.f32 -1.4531521, %v1021_v17  ;;  %v770_v63 = vpop.f32.mrf.mxu0 }
 0x147   : > { %v771_v20 = vadd.f32 %v2437_v6, %v770_v63 }
 0x148   : > { %v1032_v21 = vmul.f32 %v1030_v18, %v1003_v60  ;;  %v1025_v22 = vmul.f32 %v1023_v19, %v1018_v4 }
 0x14a   : > { %v1034_v23 = vadd.f32 0.2548296, %v1032_v21  ;;  %v1027_v24 = vadd.f32 1.4214138, %v1025_v22 }
 0x14c   : > { %v1036_v26 = vmul.f32 %v1034_v23, %v1003_v60  ;;  %v1029_v28 = vmul.f32 %v1027_v24, %v1018_v4 }
 0x14e   : > { %v1046_v2 = vmul.f32 %v2457_v27, %v1036_v26  ;;  %v1031_v29 = vadd.f32 -0.28449672, %v1029_v28 }
 0x150   : > { %v1048_v30 = vsub.f32 1.0, %v1046_v2  ;;  %v1033_v31 = vmul.f32 %v1031_v29, %v1018_v4 }
 0x152   : > { %v1052_v32 = vsub.f32 0.0, %v1048_v30  ;;  %v1035_v34 = vadd.f32 0.2548296, %v1033_v31 }
 0x154   : > { %v1054_v36 = vsel %vm1050_vm8, %v1048_v30, %v1052_v32  ;;  %v1037_v38 = vmul.f32 %v1035_v34, %v1018_v4 }
 0x155   : > { %v1056_v39 = vadd.f32 1.0, %v1054_v36 }
 0x156   : > { %v1047_v41 = vmul.f32 %v2459_v40, %v1037_v38 }
 0x157   : > { %v1058_v44 = vmul.f32 %v1056_v39, %v980_v37 }
 0x158   : > { %v1049_v45 = vsub.f32 1.0, %v1047_v41 }
 0x159   : > { %v1062_v46 = vrot.slane %v1058_v44, 7 }
 0x15a   : > { %v1053_v47 = vsub.f32 0.0, %v1049_v45 }
 0x15b   : > { %v1067_v48 = vsel %vm855_vm11, 0.0, %v1062_v46 }
 0x15c   : > { %2229 = vmatmul.msk.f32.vlgmr.msrb.gmra.mxu1 %vm1079_vm9, %v1067_v48  ;;  %v1055_v35 = vsel %vm1051_vm10, %v1049_v45, %v1053_v47  ;;  %v1074_v53 = vrot.slane %v1067_v48, 1  ;;  %v1136_v54 = vrot.slane %v1067_v48, 2 }
 0x15d   : > { %v1057_v50 = vadd.f32 1.0, %v1055_v35 }
 0x15f   : > { %v1059_v33 = vmul.f32 %v1057_v50, %v981_v49 }
 0x161   : > { %v1063_v51 = vrot.slane %v1059_v33, 7 }
 0x163   : > { %v1064_v52 = vsel %vm855_vm11, %v1062_v46, %v1063_v51  ;;  %v1068_v42 = vsel %vm855_vm11, %v1063_v51, 0.0  ;;  %v1333_v46 = vld [vmem:[#allocation11 + $0x10] sm:$0xff] }
 0x164   : > { %v1075_v55 = vrot.slane %v1064_v52, 1  ;;  %2230 = vmatmul.msk.f32.gmra.mxu1 %vm1079_vm9, %v1064_v52  ;;  %v1137_v56 = vrot.slane %v1064_v52, 2  ;;  %v1077_v58 = vrot.slane %v1068_v42, 1  ;;  %v1139_v59 = vrot.slane %v1068_v42, 2 }
 0x165   : > { %1358 = vmatpush.msra.mxu1 %v1333_v46 }
 0x166   : > { %v1076_v57 = vsel %vm868_vm14, %v1074_v53, %v1075_v55  ;;  %v1138_v43 = vsel %vm936_vm13, %v1136_v54, %v1137_v56  ;;  %v1078_v60 = vsel %vm868_vm14, %v1075_v55, %v1077_v58  ;;  %v1140_v61 = vsel %vm936_vm13, %v1137_v56, %v1139_v59 }
 0x167   : > { %2227 = vmatmul.msk.f32.vlgmr.msrb.gmra.mxu0 %vm1079_vm9, %v1076_v57  ;;  %2231 = vmatmul.msk.f32.vlgmr.msrb.gmra.mxu2 %vm1079_vm9, %v1138_v43 }
 0x16f   : > { %2228 = vmatmul.msk.f32.gmra.mxu0 %vm1079_vm9, %v1078_v60  ;;  %2232 = vmatmul.msk.f32.gmra.mxu2 %vm1079_vm9, %v1140_v61 }
 0x1d9   : > { %v1128_v5 = vpop.f32.mrf.mxu1 }
 0x1e1   : > { %v1131_v4 = vpop.f32.mrf.mxu1 }
 0x1e4   : > { %v1101_v0 = vpop.f32.mrf.mxu0 }
 0x1e5   : > { %v1129_v7 = vadd.f32 %v1128_v5, %v1101_v0 }
 0x1ea   : > { %v1162_v9 = vpop.f32.mrf.mxu2 }
 0x1eb   : > { %v1168_v10 = vadd.f32 %v1162_v9, %v1129_v7 }
 0x1ec   : > { %v1104_v14 = vpop.f32.mrf.mxu0 }
 0x1ed   : > { %v1174_v1 = vadd.f32 %v2438_v8, %v1168_v10  ;;  %v1132_v16 = vadd.f32 %v1131_v4, %v1104_v14 }
 0x1ef   : > { %v3289_v3 = vadd.f32 %v1174_v1, %v768_v11 }
 0x1f1   : > { %v3292_v15 = vmul.f32 0.70710677, %v3289_v3 }
 0x1f2   : > { %v1165_v17 = vpop.f32.mrf.mxu2 }
 0x1f3   : > { %v1182_v18 = vand.u32 2147483647, %v3292_v15  ;;  %v1169_v19 = vadd.f32 %v1165_v17, %v1132_v16  ;;  %vm1248_vm5 = vcmp.ge.f32.partialorder %v3292_v15, 0.0  ;;  %v1178_v16 = vmul.f32 0.5, %v3289_v3 }
 0x1f5   : > { %v1184_v21 = vmul.f32 0.3275911, %v1182_v18  ;;  %v1175_v22 = vadd.f32 %v2438_v8, %v1169_v19  ;;  %v1236_v40 = vmul.f32 %v1182_v18, %v1182_v18 }
 0x1f7   : > { %v1186_v23 = vadd.f32 1.0, %v1184_v21  ;;  %v3295_v24 = vadd.f32 %v1175_v22, %v771_v20  ;;  %v1238_v49 = vsub.f32 0.0, %v1236_v40 }
 0x1f9   : > { %2460 = vrcp.f32 %v1186_v23  ;;  %v3298_v25 = vmul.f32 0.70710677, %v3295_v24  ;;  %v1199_v31 = vand.u32 2147483648, %v1186_v23  ;;  %v1197_v34 = vand.u32 2147483647, %v1186_v23 }
 0x1fa   : > { %vm1193_vm12 = vweird.f32 %v1186_v23  ;;  %v1240_v55 = vmul.f32 1.442695, %v1238_v49  ;;  %v2439_v49 = vld [vmem:[#allocation13] ss:$0 sm:$0xff] }
 0x1fb   : > { %v1183_v26 = vand.u32 2147483647, %v3298_v25  ;;  %v1200_v37 = vor.u32 1.1754944e-38, %v1199_v31  ;;  %vm1198_vm15 = vcmp.eq.f32.partialorder %v1197_v34, 8.507059e+37  ;;  %vm1249_vm7 = vcmp.ge.f32.partialorder %v3298_v25, 0.0 }
 0x1fd   : > { %v1185_v27 = vmul.f32 0.3275911, %v1183_v26  ;;  %v1237_v57 = vmul.f32 %v1183_v26, %v1183_v26 }
 0x1ff   : > { %v2461_v28 = vpop.eup %2460  ;;  %v1187_v29 = vadd.f32 1.0, %v1185_v27  ;;  %v1239_v61 = vsub.f32 0.0, %v1237_v57 }
 0x200   : > { %v1189_v2 = vmul.f32 %v2461_v28, %v1186_v23  ;;  %vm1194_vm11 = vweird.f32 %v2461_v28 }
 0x201   : > { %2462 = vrcp.f32 %v1187_v29  ;;  %vm1195_vm14 = vmor %vm1193_vm12, %vm1194_vm11  ;;  %v1214_v48 = vand.u32 2147483648, %v1187_v29  ;;  %v1212_v33 = vand.u32 2147483647, %v1187_v29  ;;  %vm1208_vm2 = vweird.f32 %v1187_v29 }
 0x202   : > { %v1190_v30 = vsub.f32 1.0, %v1189_v2  ;;  %2464 = vpow2.f32 %v1240_v55  ;;  %v1242_v6 = vmul.f32 1.442695, %v1239_v61 }
 0x203   : > { %v1215_v53 = vor.u32 1.1754944e-38, %v1214_v48  ;;  %vm1213_vm4 = vcmp.eq.f32.partialorder %v1212_v33, 8.507059e+37 }
 0x204   : > { %v1191_v32 = vmul.f32 %v2461_v28, %v1190_v30  ;;  %2466 = vpow2.f32 %v1242_v6 }
 0x206   : > { %v1192_v36 = vadd.f32 %v2461_v28, %v1191_v32 }
 0x207   : > { %v2463_v38 = vpop.eup %2462 }
 0x208   : > { %v1196_v39 = vsel %vm1195_vm14, %v2461_v28, %v1192_v36  ;;  %v1204_v41 = vmul.f32 %v2463_v38, %v1187_v29  ;;  %vm1209_vm1 = vweird.f32 %v2463_v38  ;;  %v2465_v8 = vpop.eup %2464  ;;  %v1179_v28 = vmul.f32 0.5, %v3295_v24 }
 0x209   : > { %v1201_v44 = vsel %vm1198_vm15, %v1200_v37, %v1196_v39  ;;  %vm1210_vm3 = vmor %vm1208_vm2, %vm1209_vm1 }
 0x20a   : > { %v1218_v45 = vmul.f32 1.0614054, %v1201_v44  ;;  %v1205_v47 = vsub.f32 1.0, %v1204_v41  ;;  %v2467_v19 = vpop.eup %2466 }
 0x20c   : > { %v1220_v35 = vadd.f32 -1.4531521, %v1218_v45  ;;  %v1206_v50 = vmul.f32 %v2463_v38, %v1205_v47 }
 0x20e   : > { %v1222_v51 = vmul.f32 %v1220_v35, %v1201_v44  ;;  %v1207_v52 = vadd.f32 %v2463_v38, %v1206_v50 }
 0x210   : > { %v1224_v54 = vadd.f32 1.4214138, %v1222_v51  ;;  %v1211_v56 = vsel %vm1210_vm3, %v2463_v38, %v1207_v52  ;;  %v1465_v51 = vld [vmem:[#allocation14 + $0x8] sm:$0xff]  ;;  %v1463_v52 = vld [vmem:[#allocation14] sm:$0xff] }
 0x211   : > { %v1216_v42 = vsel %vm1213_vm4, %v1215_v53, %v1211_v56  ;;  %1492 = vmatpush.msra.mxu2 %v1465_v51  ;;  %1519 = vmatpush.msra.mxu3 %v1463_v52 }
 0x212   : > { %v1226_v43 = vmul.f32 %v1224_v54, %v1201_v44  ;;  %v1219_v58 = vmul.f32 1.0614054, %v1216_v42 }
 0x214   : > { %v1228_v59 = vadd.f32 -0.28449672, %v1226_v43  ;;  %v1221_v60 = vadd.f32 -1.4531521, %v1219_v58 }
 0x216   : > { %v1230_v62 = vmul.f32 %v1228_v59, %v1201_v44  ;;  %v1223_v63 = vmul.f32 %v1221_v60, %v1216_v42 }
 0x218   : > { %v1232_v0 = vadd.f32 0.2548296, %v1230_v62  ;;  %v1225_v5 = vadd.f32 1.4214138, %v1223_v63 }
 0x21a   : > { %v1234_v7 = vmul.f32 %v1232_v0, %v1201_v44  ;;  %v1227_v9 = vmul.f32 %v1225_v5, %v1216_v42 }
 0x21c   : > { %v1244_v10 = vmul.f32 %v2465_v8, %v1234_v7  ;;  %v1229_v11 = vadd.f32 -0.28449672, %v1227_v9 }
 0x21e   : > { %v1246_v1 = vsub.f32 1.0, %v1244_v10  ;;  %v1231_v12 = vmul.f32 %v1229_v11, %v1216_v42 }
 0x220   : > { %v1250_v13 = vsub.f32 0.0, %v1246_v1  ;;  %v1233_v14 = vadd.f32 0.2548296, %v1231_v12 }
 0x222   : > { %v1252_v4 = vsel %vm1248_vm5, %v1246_v1, %v1250_v13  ;;  %v1235_v18 = vmul.f32 %v1233_v14, %v1216_v42 }
 0x223   : > { %v1254_v17 = vadd.f32 1.0, %v1252_v4 }
 0x224   : > { %v1245_v21 = vmul.f32 %v2467_v19, %v1235_v18  ;;  %v1528_v18 = vld [vmem:[#allocation14 + $0x10] sm:$0xff] }
 0x225   : > { %v1256_v20 = vmul.f32 %v1254_v17, %v1178_v16  ;;  %1553 = vmatpush.msrb.mxu0 %v1528_v18  ;;  %v1571_v18 = vld [vmem:[#allocation20] sm:$0xff] }
 0x226   : > { %v1247_v23 = vsub.f32 1.0, %v1245_v21  ;;  %1597 = vmatpush.msrb.mxu1 %v1571_v18 }
 0x227   : > { %v1261_v22 = vrot.slane %v1256_v20, 6 }
 0x228   : > { %v1251_v27 = vsub.f32 0.0, %v1247_v23 }
 0x229   : > { %v1266_v26 = vsel %vm1260_vm6, 0.0, %v1261_v22 }
 0x22a   : > { %2235 = vmatmul.msk.f32.vlgmr.msra.gmra.mxu0 %vm1079_vm9, %v1266_v26  ;;  %v1253_v15 = vsel %vm1249_vm7, %v1247_v23, %v1251_v27  ;;  %v1334_v32 = vrot.slane %v1266_v26, 4  ;;  %v1273_v37 = vrot.slane %v1266_v26, 2 }
 0x22b   : > { %v1255_v2 = vadd.f32 1.0, %v1253_v15 }
 0x22d   : > { %v1257_v29 = vmul.f32 %v1255_v2, %v1179_v28 }
 0x22f   : > { %v1262_v30 = vrot.slane %v1257_v29, 6 }
 0x231   : > { %v1263_v31 = vsel %vm1260_vm6, %v1261_v22, %v1262_v30  ;;  %v1267_v39 = vsel %vm1260_vm6, %v1262_v30, 0.0 }
 0x232   : > { %v1274_v34 = vrot.slane %v1263_v31, 2  ;;  %2236 = vmatmul.msk.f32.gmra.mxu0 %vm1079_vm9, %v1263_v31  ;;  %v1335_v36 = vrot.slane %v1263_v31, 4  ;;  %v1276_v40 = vrot.slane %v1267_v39, 2  ;;  %v1337_v41 = vrot.slane %v1267_v39, 4 }
 0x234   : > { %v1275_v38 = vsel %vm936_vm13, %v1273_v37, %v1274_v34  ;;  %v1336_v25 = vsel %vm746_vm0, %v1334_v32, %v1335_v36  ;;  %v1277_v44 = vsel %vm936_vm13, %v1274_v34, %v1276_v40  ;;  %v1338_v45 = vsel %vm746_vm0, %v1335_v36, %v1337_v41 }
 0x235   : > { %2233 = vmatmul.msk.f32.vlgmr.msrb.gmra.mxu3 %vm1079_vm9, %v1275_v38  ;;  %2237 = vmatmul.msk.f32.vlgmr.msra.gmra.mxu1 %vm1079_vm9, %v1336_v25 }
 0x23d   : > { %2234 = vmatmul.msk.f32.gmra.mxu3 %vm1079_vm9, %v1277_v44  ;;  %2238 = vmatmul.msk.f32.gmra.mxu1 %vm1079_vm9, %v1338_v45 }
 0x2a7   : > { %v1326_v46 = vpop.f32.mrf.mxu0 }
 0x2af   : > { %v1329_v54 = vpop.f32.mrf.mxu0 }
 0x2b2   : > { %v1360_v47 = vpop.f32.mrf.mxu1 }
 0x2b8   : > { %v1299_v48 = vpop.f32.mrf.mxu3 }
 0x2b9   : > { %v1327_v35 = vadd.f32 %v1326_v46, %v1299_v48 }
 0x2ba   : > { %v1363_v43 = vpop.f32.mrf.mxu1 }
 0x2bb   : > { %v1366_v50 = vadd.f32 %v1360_v47, %v1327_v35 }
 0x2bd   : > { %v3318_v33 = vadd.f32 %v2439_v49, %v1366_v50 }
 0x2bf   : > { %v3321_v53 = vmul.f32 0.70710677, %v3318_v33 }
 0x2c0   : > { %v1302_v55 = vpop.f32.mrf.mxu3 }
 0x2c1   : > { %v1378_v56 = vand.u32 2147483647, %v3321_v53  ;;  %v1330_v57 = vadd.f32 %v1329_v54, %v1302_v55  ;;  %vm1444_vm3 = vcmp.ge.f32.partialorder %v3321_v53, 0.0 }
 0x2c3   : > { %v1380_v42 = vmul.f32 0.3275911, %v1378_v56  ;;  %v1367_v58 = vadd.f32 %v1363_v43, %v1330_v57  ;;  %v1432_v14 = vmul.f32 %v1378_v56, %v1378_v56  ;;  %v1374_v56 = vmul.f32 0.5, %v3318_v33 }
 0x2c5   : > { %v1382_v59 = vadd.f32 1.0, %v1380_v42  ;;  %v3324_v60 = vadd.f32 %v2439_v49, %v1367_v58  ;;  %v1434_v22 = vsub.f32 0.0, %v1432_v14 }
 0x2c7   : > { %2468 = vrcp.f32 %v1382_v59  ;;  %v3327_v61 = vmul.f32 0.70710677, %v3324_v60  ;;  %v1395_v8 = vand.u32 2147483648, %v1382_v59  ;;  %v1393_v10 = vand.u32 2147483647, %v1382_v59 }
 0x2c8   : > { %vm1389_vm10 = vweird.f32 %v1382_v59  ;;  %v1436_v29 = vmul.f32 1.442695, %v1434_v22  ;;  %v1375_v53 = vmul.f32 0.5, %v3324_v60 }
 0x2c9   : > { %v1379_v62 = vand.u32 2147483647, %v3327_v61  ;;  %v1396_v1 = vor.u32 1.1754944e-38, %v1395_v8  ;;  %vm1394_vm12 = vcmp.eq.f32.partialorder %v1393_v10, 8.507059e+37  ;;  %vm1445_vm4 = vcmp.ge.f32.partialorder %v3327_v61, 0.0 }
 0x2cb   : > { %v1381_v63 = vmul.f32 0.3275911, %v1379_v62  ;;  %v1433_v31 = vmul.f32 %v1379_v62, %v1379_v62 }
 0x2cd   : > { %v2469_v0 = vpop.eup %2468  ;;  %v1383_v6 = vadd.f32 1.0, %v1381_v63  ;;  %v1435_v25 = vsub.f32 0.0, %v1433_v31 }
 0x2ce   : > { %v1385_v5 = vmul.f32 %v2469_v0, %v1382_v59  ;;  %vm1390_vm8 = vweird.f32 %v2469_v0 }
 0x2cf   : > { %2470 = vrcp.f32 %v1383_v6  ;;  %vm1391_vm11 = vmor %vm1389_vm10, %vm1390_vm8  ;;  %v1410_v20 = vand.u32 2147483648, %v1383_v6  ;;  %v1408_v26 = vand.u32 2147483647, %v1383_v6  ;;  %vm1404_vm15 = vweird.f32 %v1383_v6 }
 0x2d0   : > { %v1386_v7 = vsub.f32 1.0, %v1385_v5  ;;  %2472 = vpow2.f32 %v1436_v29  ;;  %v1438_v45 = vmul.f32 1.442695, %v1435_v25 }
 0x2d1   : > { %v1411_v28 = vor.u32 1.1754944e-38, %v1410_v20  ;;  %vm1409_vm2 = vcmp.eq.f32.partialorder %v1408_v26, 8.507059e+37 }
 0x2d2   : > { %v1387_v9 = vmul.f32 %v2469_v0, %v1386_v7  ;;  %2474 = vpow2.f32 %v1438_v45 }
 0x2d4   : > { %v1388_v11 = vadd.f32 %v2469_v0, %v1387_v9 }
 0x2d5   : > { %v2471_v12 = vpop.eup %2470 }
 0x2d6   : > { %v1392_v13 = vsel %vm1391_vm11, %v2469_v0, %v1388_v11  ;;  %v1400_v4 = vmul.f32 %v2471_v12, %v1383_v6  ;;  %vm1405_vm14 = vweird.f32 %v2471_v12  ;;  %v2473_v47 = vpop.eup %2472 }
 0x2d7   : > { %v1397_v16 = vsel %vm1394_vm12, %v1396_v1, %v1392_v13  ;;  %vm1406_vm1 = vmor %vm1404_vm15, %vm1405_vm14 }
 0x2d8   : > { %v1414_v17 = vmul.f32 1.0614054, %v1397_v16  ;;  %v1401_v19 = vsub.f32 1.0, %v1400_v4  ;;  %v2475_v42 = vpop.eup %2474 }
 0x2da   : > { %v1416_v21 = vadd.f32 -1.4531521, %v1414_v17  ;;  %v1402_v23 = vmul.f32 %v2471_v12, %v1401_v19 }
 0x2dc   : > { %v1418_v27 = vmul.f32 %v1416_v21, %v1397_v16  ;;  %v1403_v15 = vadd.f32 %v2471_v12, %v1402_v23  ;;  %v2440_v23 = vld [vmem:[#allocation16] ss:$0 sm:$0xff] }
 0x2de   : > { %v1420_v2 = vadd.f32 1.4214138, %v1418_v27  ;;  %v1407_v30 = vsel %vm1406_vm1, %v2471_v12, %v1403_v15  ;;  %v1696_v15 = vld [vmem:[#allocation17 + $0x8] sm:$0xff] }
 0x2df   : > { %v1412_v34 = vsel %vm1409_vm2, %v1411_v28, %v1407_v30  ;;  %v1694_v28 = vld [vmem:[#allocation17] sm:$0xff]  ;;  %1723 = vmatpush.msrb.mxu2 %v1696_v15 }
 0x2e0   : > { %v1422_v32 = vmul.f32 %v1420_v2, %v1397_v16  ;;  %v1415_v36 = vmul.f32 1.0614054, %v1412_v34  ;;  %1750 = vmatpush.msrb.mxu3 %v1694_v28 }
 0x2e2   : > { %v1424_v37 = vadd.f32 -0.28449672, %v1422_v32  ;;  %v1417_v38 = vadd.f32 -1.4531521, %v1415_v36 }
 0x2e4   : > { %v1426_v39 = vmul.f32 %v1424_v37, %v1397_v16  ;;  %v1419_v40 = vmul.f32 %v1417_v38, %v1412_v34 }
 0x2e6   : > { %v1428_v41 = vadd.f32 0.2548296, %v1426_v39  ;;  %v1421_v44 = vadd.f32 1.4214138, %v1419_v40 }
 0x2e8   : > { %v1430_v46 = vmul.f32 %v1428_v41, %v1397_v16  ;;  %v1423_v48 = vmul.f32 %v1421_v44, %v1412_v34 }
 0x2ea   : > { %v1440_v35 = vmul.f32 %v2473_v47, %v1430_v46  ;;  %v1425_v49 = vadd.f32 -0.28449672, %v1423_v48 }
 0x2ec   : > { %v1442_v50 = vsub.f32 1.0, %v1440_v35  ;;  %v1427_v51 = vmul.f32 %v1425_v49, %v1412_v34 }
 0x2ee   : > { %v1446_v52 = vsub.f32 0.0, %v1442_v50  ;;  %v1429_v54 = vadd.f32 0.2548296, %v1427_v51 }
 0x2f0   : > { %v1448_v55 = vsel %vm1444_vm3, %v1442_v50, %v1446_v52  ;;  %v1431_v43 = vmul.f32 %v1429_v54, %v1412_v34 }
 0x2f1   : > { %v1450_v57 = vadd.f32 1.0, %v1448_v55 }
 0x2f2   : > { %v1441_v59 = vmul.f32 %v2475_v42, %v1431_v43  ;;  %v1759_v42 = vld [vmem:[#allocation17 + $0x10] sm:$0xff] }
 0x2f3   : > { %v1452_v58 = vmul.f32 %v1450_v57, %v1374_v56  ;;  %1777 = vmatpush.msra.mxu0 %v1759_v42  ;;  %v1883_v42 = vld [vmem:[%s3478_s13 + $0x8] sm:$0xff] }
 0x2f4   : > { %v1443_v63 = vsub.f32 1.0, %v1441_v59 }
 0x2f5   : > { %v1456_v62 = vrot.slane %v1452_v58, 6 }
 0x2f6   : > { %v1447_v5 = vsub.f32 0.0, %v1443_v63 }
 0x2f7   : > { %v1461_v0 = vsel %vm1260_vm6, 0.0, %v1456_v62 }
 0x2f8   : > { %2241 = vmatmul.msk.f32.vlgmr.msra.gmra.mxu3 %vm1079_vm9, %v1461_v0  ;;  %v1449_v6 = vsel %vm1445_vm4, %v1443_v63, %v1447_v5  ;;  %v1468_v10 = vrot.slane %v1461_v0, 2  ;;  %v1529_v11 = vrot.slane %v1461_v0, 4 }
 0x2f9   : > { %v1451_v7 = vadd.f32 1.0, %v1449_v6 }
 0x2fb   : > { %v1453_v8 = vmul.f32 %v1451_v7, %v1375_v53 }
 0x2fd   : > { %v1457_v33 = vrot.slane %v1453_v8, 6 }
 0x2ff   : > { %v1458_v9 = vsel %vm1260_vm6, %v1456_v62, %v1457_v33  ;;  %v1462_v60 = vsel %vm1260_vm6, %v1457_v33, 0.0 }
 0x300   : > { %v1469_v1 = vrot.slane %v1458_v9, 2  ;;  %2242 = vmatmul.msk.f32.gmra.mxu3 %vm1079_vm9, %v1458_v9  ;;  %v1530_v12 = vrot.slane %v1458_v9, 4  ;;  %v1471_v14 = vrot.slane %v1462_v60, 2  ;;  %v1532_v4 = vrot.slane %v1462_v60, 4 }
 0x302   : > { %v1470_v13 = vsel %vm936_vm13, %v1468_v10, %v1469_v1  ;;  %v1531_v61 = vsel %vm746_vm0, %v1529_v11, %v1530_v12  ;;  %v1472_v16 = vsel %vm936_vm13, %v1469_v1, %v1471_v14  ;;  %v1533_v17 = vsel %vm746_vm0, %v1530_v12, %v1532_v4 }
 0x303   : > { %2239 = vmatmul.msk.f32.vlgmr.msra.gmra.mxu2 %vm1079_vm9, %v1470_v13  ;;  %2243 = vmatmul.msk.f32.vlgmr.msrb.gmra.mxu0 %vm1079_vm9, %v1531_v61 }
 0x304   : > { %1940 = vmatpush.msra.mxu2 %v1883_v42 }
 0x30b   : > { %2240 = vmatmul.msk.f32.gmra.mxu2 %vm1079_vm9, %v1472_v16  ;;  %2244 = vmatmul.msk.f32.gmra.mxu0 %vm1079_vm9, %v1533_v17 }
 0x37b   : > { %v1521_v19 = vpop.f32.mrf.mxu3 }
 0x380   : > { %v1555_v20 = vpop.f32.mrf.mxu0 }
 0x383   : > { %v1524_v29 = vpop.f32.mrf.mxu3 }
 0x386   : > { %v1494_v21 = vpop.f32.mrf.mxu2 }
 0x387   : > { %v1522_v22 = vadd.f32 %v1521_v19, %v1494_v21 }
 0x388   : > { %v1558_v34 = vpop.f32.mrf.mxu0 }
 0x389   : > { %v1561_v26 = vadd.f32 %v1555_v20, %v1522_v22 }
 0x38b   : > { %v1567_v27 = vadd.f32 %v2440_v23, %v1561_v26 }
 0x38d   : > { %v3348_v2 = vadd.f32 %v1567_v27, %v3289_v3 }
 0x38e   : > { %v1497_v30 = vpop.f32.mrf.mxu2 }
 0x38f   : > { %v3351_v31 = vmul.f32 0.70710677, %v3348_v2  ;;  %v1525_v32 = vadd.f32 %v1524_v29, %v1497_v30  ;;  %2245 = vmatmul.msk.f32.vlgmr.msrb.gmra.mxu1 %vm1079_vm9, %v3348_v2  ;;  %v1605_v30 = vmul.f32 0.5, %v3348_v2 }
 0x391   : > { %v1609_v36 = vand.u32 2147483647, %v3351_v31  ;;  %v1562_v37 = vadd.f32 %v1558_v34, %v1525_v32  ;;  %vm1675_vm14 = vcmp.ge.f32.partialorder %v3351_v31, 0.0 }
 0x393   : > { %v1611_v38 = vmul.f32 0.3275911, %v1609_v36  ;;  %v1568_v25 = vadd.f32 %v2440_v23, %v1562_v37  ;;  %v1663_v55 = vmul.f32 %v1609_v36, %v1609_v36 }
 0x395   : > { %v1613_v39 = vadd.f32 1.0, %v1611_v38  ;;  %v3357_v40 = vadd.f32 %v1568_v25, %v3295_v24  ;;  %v1665_v63 = vsub.f32 0.0, %v1663_v55 }
 0x397   : > { %2476 = vrcp.f32 %v1613_v39  ;;  %2246 = vmatmul.msk.f32.gmra.mxu1 %vm1079_vm9, %v3357_v40  ;;  %v3362_v3 = vmul.f32 0.70710677, %v3357_v40  ;;  %v1626_v35 = vand.u32 2147483648, %v1613_v39  ;;  %v1624_v24 = vand.u32 2147483647, %v1613_v39 }
 0x398   : > { %vm1620_vm5 = vweird.f32 %v1613_v39  ;;  %v1667_v33 = vmul.f32 1.442695, %v1665_v63  ;;  %v1606_v31 = vmul.f32 0.5, %v3357_v40 }
 0x399   : > { %v1610_v41 = vand.u32 2147483647, %v3362_v3  ;;  %v1627_v51 = vor.u32 1.1754944e-38, %v1626_v35  ;;  %vm1625_vm7 = vcmp.eq.f32.partialorder %v1624_v24, 8.507059e+37  ;;  %vm1676_vm15 = vcmp.ge.f32.partialorder %v3362_v3, 0.0 }
 0x39b   : > { %v1612_v44 = vmul.f32 0.3275911, %v1610_v41  ;;  %v1664_v10 = vmul.f32 %v1610_v41, %v1610_v41 }
 0x39d   : > { %v2477_v45 = vpop.eup %2476  ;;  %v1614_v47 = vadd.f32 1.0, %v1612_v44  ;;  %v1666_v60 = vsub.f32 0.0, %v1664_v10 }
 0x39e   : > { %v1616_v46 = vmul.f32 %v2477_v45, %v1613_v39  ;;  %vm1621_vm13 = vweird.f32 %v2477_v45 }
 0x39f   : > { %2478 = vrcp.f32 %v1614_v47  ;;  %vm1622_vm6 = vmor %vm1620_vm5, %vm1621_vm13  ;;  %v1641_v59 = vand.u32 2147483648, %v1614_v47  ;;  %v1639_v5 = vand.u32 2147483647, %v1614_v47  ;;  %vm1635_vm10 = vweird.f32 %v1614_v47 }
 0x3a0   : > { %v1617_v48 = vsub.f32 1.0, %v1616_v46  ;;  %2480 = vpow2.f32 %v1667_v33  ;;  %v1669_v18 = vmul.f32 1.442695, %v1666_v60 }
 0x3a1   : > { %v1642_v7 = vor.u32 1.1754944e-38, %v1641_v59  ;;  %vm1640_vm12 = vcmp.eq.f32.partialorder %v1639_v5, 8.507059e+37  ;;  %v2254_v59 = vld [vmem:[%s3478_s13 + $0x18] sm:$0xff] }
 0x3a2   : > { %v1618_v49 = vmul.f32 %v2477_v45, %v1617_v48  ;;  %2482 = vpow2.f32 %v1669_v18  ;;  %1913 = vmatpush.msra.mxu1 %v2254_v59 }
 0x3a4   : > { %v1619_v50 = vadd.f32 %v2477_v45, %v1618_v49 }
 0x3a5   : > { %v2479_v52 = vpop.eup %2478 }
 0x3a6   : > { %v1623_v54 = vsel %vm1622_vm6, %v2477_v45, %v1619_v50  ;;  %v1631_v56 = vmul.f32 %v2479_v52, %v1614_v47  ;;  %vm1636_vm8 = vweird.f32 %v2479_v52  ;;  %v2481_v20 = vpop.eup %2480 }
 0x3a7   : > { %v1628_v57 = vsel %vm1625_vm7, %v1627_v51, %v1623_v54  ;;  %vm1637_vm11 = vmor %vm1635_vm10, %vm1636_vm8  ;;  %vm1894_vm8 = vcmask 130048  }
 0x3a8   : > { %v1645_v43 = vmul.f32 1.0614054, %v1628_v57  ;;  %v1632_v58 = vsub.f32 1.0, %v1631_v56  ;;  %v2483_v36 = vpop.eup %2482  ;;  %v2442_v56 = vld [vmem:[#allocation19] ss:$0 sm:$0xff] }
 0x3aa   : > { %v1647_v62 = vadd.f32 -1.4531521, %v1645_v43  ;;  %v1633_v0 = vmul.f32 %v2479_v52, %v1632_v58  ;;  %v2260_v58 = vld [vmem:[%s3478_s13 + $0x28] sm:$0xff] }
 0x3ab   : > { %1968 = vmatpush.msra.mxu3 %v2260_v58 }
 0x3ac   : > { %v1649_v6 = vmul.f32 %v1647_v62, %v1628_v57  ;;  %v1634_v53 = vadd.f32 %v2479_v52, %v1633_v0  ;;  %v1882_v62 = vld [vmem:[%s3478_s13] sm:$0xff] }
 0x3ad   : > { %1941 = vmatpush.msra.mxu2 %v1882_v62 }
 0x3ae   : > { %v1651_v8 = vadd.f32 1.4214138, %v1649_v6  ;;  %v1638_v9 = vsel %vm1637_vm11, %v2479_v52, %v1634_v53 }
 0x3af   : > { %v1643_v1 = vsel %vm1640_vm12, %v1642_v7, %v1638_v9 }
 0x3b0   : > { %v1653_v11 = vmul.f32 %v1651_v8, %v1628_v57  ;;  %v1646_v12 = vmul.f32 1.0614054, %v1643_v1 }
 0x3b2   : > { %v1655_v13 = vadd.f32 -0.28449672, %v1653_v11  ;;  %v1648_v61 = vadd.f32 -1.4531521, %v1646_v12 }
 0x3b4   : > { %v1657_v14 = vmul.f32 %v1655_v13, %v1628_v57  ;;  %v1650_v4 = vmul.f32 %v1648_v61, %v1643_v1 }
 0x3b6   : > { %v1659_v16 = vadd.f32 0.2548296, %v1657_v14  ;;  %v1652_v17 = vadd.f32 1.4214138, %v1650_v4 }
 0x3b8   : > { %v1661_v19 = vmul.f32 %v1659_v16, %v1628_v57  ;;  %v1654_v21 = vmul.f32 %v1652_v17, %v1643_v1 }
 0x3ba   : > { %v1671_v22 = vmul.f32 %v2481_v20, %v1661_v19  ;;  %v1656_v23 = vadd.f32 -0.28449672, %v1654_v21 }
 0x3bc   : > { %v1673_v26 = vsub.f32 1.0, %v1671_v22  ;;  %v1658_v27 = vmul.f32 %v1656_v23, %v1643_v1 }
 0x3be   : > { %v1677_v15 = vsub.f32 0.0, %v1673_v26  ;;  %v1660_v28 = vadd.f32 0.2548296, %v1658_v27 }
 0x3c0   : > { %v1679_v29 = vsel %vm1675_vm14, %v1673_v26, %v1677_v15  ;;  %v1662_v34 = vmul.f32 %v1660_v28, %v1643_v1  ;;  %v2259_v15 = vld [vmem:[%s3478_s13 + $0x20] sm:$0xff]  ;;  %v2253_v28 = vld [vmem:[%s3478_s13 + $0x10] sm:$0xff] }
 0x3c1   : > { %v1681_v32 = vadd.f32 1.0, %v1679_v29  ;;  %1969 = vmatpush.msra.mxu3 %v2259_v15  ;;  %1914 = vmatpush.msra.mxu1 %v2253_v28  ;;  %v2443_v15 = vld [vmem:[%s3479_s14] ss:$0 sm:$0xff] }
 0x3c2   : > { %v1672_v38 = vmul.f32 %v2483_v36, %v1662_v34 }
 0x3c3   : > { %v1683_v37 = vmul.f32 %v1681_v32, %v1605_v30 }
 0x3c4   : > { %v1674_v39 = vsub.f32 1.0, %v1672_v38 }
 0x3c5   : > { %v1687_v25 = vrot.slane %v1683_v37, 4 }
 0x3c6   : > { %v1678_v44 = vsub.f32 0.0, %v1674_v39 }
 0x3c7   : > { %v1692_v41 = vsel %vm746_vm0, 0.0, %v1687_v25 }
 0x3c8   : > { %2249 = vmatmul.msk.f32.vlgmr.msrb.gmra.mxu3 %vm1079_vm9, %v1692_v41  ;;  %v1680_v45 = vsel %vm1676_vm15, %v1674_v39, %v1678_v44  ;;  %v1699_v35 = vrot.slane %v1692_v41, 4 }
 0x3c9   : > { %v1682_v46 = vadd.f32 1.0, %v1680_v45 }
 0x3cb   : > { %v1684_v47 = vmul.f32 %v1682_v46, %v1606_v31 }
 0x3cd   : > { %v1688_v2 = vrot.slane %v1684_v47, 4 }
 0x3cf   : > { %v1689_v48 = vsel %vm746_vm0, %v1687_v25, %v1688_v2  ;;  %v1693_v3 = vsel %vm746_vm0, %v1688_v2, 0.0 }
 0x3d0   : > { %v1700_v49 = vrot.slane %v1689_v48, 4  ;;  %2250 = vmatmul.msk.f32.gmra.mxu3 %vm1079_vm9, %v1689_v48  ;;  %2251 = vmatmul.msk.f32.vlgmr.msra.gmra.mxu0 %vm1079_vm9, %v1689_v48  ;;  %v1702_v50 = vrot.slane %v1693_v3, 4 }
 0x3d2   : > { %v1701_v24 = vsel %vm746_vm0, %v1699_v35, %v1700_v49  ;;  %v1703_v40 = vsel %vm746_vm0, %v1700_v49, %v1702_v50 }
 0x3d3   : > { %2247 = vmatmul.msk.f32.vlgmr.msrb.gmra.mxu2 %vm1079_vm9, %v1701_v24 }
 0x3d8   : > { %2252 = vmatmul.msk.f32.gmra.mxu0 %vm1079_vm9, %v1693_v3 }
 0x3db   : > { %2248 = vmatmul.msk.f32.gmra.mxu2 %vm1079_vm9, %v1703_v40 }
 0x44b   : > { %v1752_v51 = vpop.f32.mrf.mxu3 }
 0x44d   : > { %v1779_v52 = vpop.f32.mrf.mxu0 }
 0x453   : > { %v1755_v0 = vpop.f32.mrf.mxu3 }
 0x455   : > { %v1782_v7 = vpop.f32.mrf.mxu0 }
 0x456   : > { %v1725_v54 = vpop.f32.mrf.mxu2 }
 0x457   : > { %v1753_v55 = vadd.f32 %v1752_v51, %v1725_v54 }
 0x459   : > { %v1785_v57 = vadd.f32 %v1779_v52, %v1753_v55 }
 0x45b   : > { %v3380_v43 = vadd.f32 %v2442_v56, %v1785_v57 }
 0x45d   : > { %v3395_v63 = vmul.f32 0.70710677, %v3380_v43 }
 0x45e   : > { %v1728_v5 = vpop.f32.mrf.mxu2 }
 0x45f   : > { %v1797_v6 = vand.u32 2147483647, %v3395_v63  ;;  %v1756_v53 = vadd.f32 %v1755_v0, %v1728_v5  ;;  %vm1863_vm7 = vcmp.ge.f32.partialorder %v3395_v63, 0.0  ;;  %v1793_v5 = vmul.f32 0.5, %v3380_v43 }
 0x461   : > { %v1799_v8 = vmul.f32 0.3275911, %v1797_v6  ;;  %v1786_v33 = vadd.f32 %v1782_v7, %v1756_v53  ;;  %v1851_v22 = vmul.f32 %v1797_v6, %v1797_v6 }
 0x463   : > { %v1801_v9 = vadd.f32 1.0, %v1799_v8  ;;  %v3398_v10 = vadd.f32 %v2442_v56, %v1786_v33  ;;  %v1853_v34 = vsub.f32 0.0, %v1851_v22 }
 0x465   : > { %2484 = vrcp.f32 %v1801_v9  ;;  %v3401_v11 = vmul.f32 0.70710677, %v3398_v10  ;;  %v1814_v4 = vand.u32 2147483648, %v1801_v9  ;;  %v1812_v17 = vand.u32 2147483647, %v1801_v9 }
 0x466   : > { %vm1808_vm1 = vweird.f32 %v1801_v9  ;;  %v1855_v44 = vmul.f32 1.442695, %v1853_v34 }
 0x467   : > { %v1798_v1 = vand.u32 2147483647, %v3401_v11  ;;  %v1815_v19 = vor.u32 1.1754944e-38, %v1814_v4  ;;  %vm1813_vm3 = vcmp.eq.f32.partialorder %v1812_v17, 8.507059e+37  ;;  %vm1864_vm10 = vcmp.ge.f32.partialorder %v3401_v11, 0.0 }
 0x469   : > { %v1800_v12 = vmul.f32 0.3275911, %v1798_v1  ;;  %v1852_v31 = vmul.f32 %v1798_v1, %v1798_v1 }
 0x46b   : > { %v2485_v13 = vpop.eup %2484  ;;  %v1802_v60 = vadd.f32 1.0, %v1800_v12  ;;  %v1854_v49 = vsub.f32 0.0, %v1852_v31 }
 0x46c   : > { %v1804_v61 = vmul.f32 %v2485_v13, %v1801_v9  ;;  %vm1809_vm9 = vweird.f32 %v2485_v13 }
 0x46d   : > { %2486 = vrcp.f32 %v1802_v60  ;;  %vm1810_vm2 = vmor %vm1808_vm1, %vm1809_vm9  ;;  %v1829_v30 = vand.u32 2147483648, %v1802_v60  ;;  %v1827_v37 = vand.u32 2147483647, %v1802_v60  ;;  %vm1823_vm13 = vweird.f32 %v1802_v60 }
 0x46e   : > { %v1805_v14 = vsub.f32 1.0, %v1804_v61  ;;  %2488 = vpow2.f32 %v1855_v44  ;;  %v1857_v51 = vmul.f32 1.442695, %v1854_v49  ;;  %v1794_v61 = vmul.f32 0.5, %v3398_v10 }
 0x46f   : > { %v1830_v39 = vor.u32 1.1754944e-38, %v1829_v30  ;;  %vm1828_vm6 = vcmp.eq.f32.partialorder %v1827_v37, 8.507059e+37 }
 0x470   : > { %v1806_v16 = vmul.f32 %v2485_v13, %v1805_v14  ;;  %2490 = vpow2.f32 %v1857_v51 }
 0x472   : > { %v1807_v18 = vadd.f32 %v2485_v13, %v1806_v16 }
 0x473   : > { %v2487_v20 = vpop.eup %2486 }
 0x474   : > { %v1811_v21 = vsel %vm1810_vm2, %v2485_v13, %v1807_v18  ;;  %v1819_v23 = vmul.f32 %v2487_v20, %v1802_v60  ;;  %vm1824_vm4 = vweird.f32 %v2487_v20  ;;  %v2489_v54 = vpop.eup %2488 }
 0x475   : > { %v1816_v26 = vsel %vm1813_vm3, %v1815_v19, %v1811_v21  ;;  %vm1825_vm5 = vmor %vm1823_vm13, %vm1824_vm4 }
 0x476   : > { %v1833_v27 = vmul.f32 1.0614054, %v1816_v26  ;;  %v1820_v29 = vsub.f32 1.0, %v1819_v23  ;;  %v2491_v7 = vpop.eup %2490 }
 0x478   : > { %v1835_v32 = vadd.f32 -1.4531521, %v1833_v27  ;;  %v1821_v36 = vmul.f32 %v2487_v20, %v1820_v29  ;;  %v2441_v27 = vld [vmem:[%s3481_s16] ss:$0 sm:$0xff] }
 0x47a   : > { %v1837_v38 = vmul.f32 %v1835_v32, %v1816_v26  ;;  %v1822_v25 = vadd.f32 %v2487_v20, %v1821_v36 }
 0x47c   : > { %v1839_v41 = vadd.f32 1.4214138, %v1837_v38  ;;  %v1826_v45 = vsel %vm1825_vm5, %v2487_v20, %v1822_v25  ;;  %v1599_v20 = vpop.f32.mrf.mxu1 }
 0x47d   : > { %v1831_v47 = vsel %vm1828_vm6, %v1830_v39, %v1826_v45  ;;  %v1600_v30 = vadd.f32 %v2441_v27, %v1599_v20 }
 0x47e   : > { %v1841_v46 = vmul.f32 %v1839_v41, %v1816_v26  ;;  %v1834_v2 = vmul.f32 1.0614054, %v1831_v47 }
 0x480   : > { %v1843_v48 = vadd.f32 -0.28449672, %v1841_v46  ;;  %v1836_v35 = vadd.f32 -1.4531521, %v1834_v2 }
 0x482   : > { %v1845_v24 = vmul.f32 %v1843_v48, %v1816_v26  ;;  %v1838_v3 = vmul.f32 %v1836_v35, %v1831_v47 }
 0x484   : > { %v1847_v50 = vadd.f32 0.2548296, %v1845_v24  ;;  %v1840_v40 = vadd.f32 1.4214138, %v1838_v3  ;;  %v1602_v21 = vpop.f32.mrf.mxu1 }
 0x485   : > { %v1603_v41 = vadd.f32 %v2441_v27, %v1602_v21 }
 0x486   : > { %v1849_v52 = vmul.f32 %v1847_v50, %v1816_v26  ;;  %v1842_v55 = vmul.f32 %v1840_v40, %v1831_v47 }
 0x488   : > { %v1859_v56 = vmul.f32 %v2489_v54, %v1849_v52  ;;  %v1844_v57 = vadd.f32 -0.28449672, %v1842_v55 }
 0x48a   : > { %v1861_v42 = vsub.f32 1.0, %v1859_v56  ;;  %v1846_v58 = vmul.f32 %v1844_v57, %v1831_v47 }
 0x48c   : > { %v1865_v59 = vsub.f32 0.0, %v1861_v42  ;;  %v1848_v62 = vadd.f32 0.2548296, %v1846_v58 }
 0x48e   : > { %v1867_v0 = vsel %vm1863_vm7, %v1861_v42, %v1865_v59  ;;  %v1850_v53 = vmul.f32 %v1848_v62, %v1831_v47 }
 0x48f   : > { %v1869_v6 = vadd.f32 1.0, %v1867_v0 }
 0x490   : > { %v1860_v33 = vmul.f32 %v2491_v7, %v1850_v53 }
 0x491   : > { %v1871_v8 = vmul.f32 %v1869_v6, %v1793_v5 }
 0x492   : > { %v1862_v1 = vsub.f32 1.0, %v1860_v33 }
 0x493   : > { %v1875_v9 = vrot.slane %v1871_v8, 4 }
 0x494   : > { %v1866_v13 = vsub.f32 0.0, %v1862_v1 }
 0x495   : > { %v1880_v12 = vsel %vm746_vm0, 0.0, %v1875_v9 }
 0x496   : > { %2257 = vmatmul.msk.f32.vlgmr.msra.gmra.mxu2 %vm1894_vm8, %v1880_v12  ;;  %v1868_v63 = vsel %vm1864_vm10, %v1862_v1, %v1866_v13  ;;  %v1889_v16 = vrot.slane %v1880_v12, 4 }
 0x497   : > { %v1870_v60 = vadd.f32 1.0, %v1868_v63 }
 0x499   : > { %v1872_v43 = vmul.f32 %v1870_v60, %v1794_v61 }
 0x49b   : > { %v1876_v14 = vrot.slane %v1872_v43, 4 }
 0x49d   : > { %v1877_v4 = vsel %vm746_vm0, %v1875_v9, %v1876_v14  ;;  %v1881_v11 = vsel %vm746_vm0, %v1876_v14, 0.0 }
 0x49e   : > { %v1890_v17 = vrot.slane %v1877_v4, 4  ;;  %2258 = vmatmul.msk.f32.gmra.mxu2 %vm1894_vm8, %v1877_v4  ;;  %2261 = vmatmul.msk.f32.vlgmr.msra.gmra.mxu3 %vm1894_vm8, %v1877_v4  ;;  %v1892_v19 = vrot.slane %v1881_v11, 4 }
 0x4a0   : > { %v1891_v18 = vsel %vm746_vm0, %v1889_v16, %v1890_v17  ;;  %v1893_v10 = vsel %vm746_vm0, %v1890_v17, %v1892_v19 }
 0x4a1   : > { %2255 = vmatmul.msk.f32.vlgmr.msra.gmra.mxu1 %vm1894_vm8, %v1891_v18 }
 0x4a6   : > { %2262 = vmatmul.msk.f32.gmra.mxu3 %vm1894_vm8, %v1881_v11 }
 0x4a9   : > { %2256 = vmatmul.msk.f32.gmra.mxu1 %vm1894_vm8, %v1893_v10 }
 0x519   : > { %v1943_v22 = vpop.f32.mrf.mxu2 }
 0x51e   : > { %v1916_v23 = vpop.f32.mrf.mxu1 }
 0x51f   : > { %v1944_v26 = vadd.f32 %v1943_v22, %v1916_v23 }
 0x521   : > { %v1971_v28 = vpop.f32.mrf.mxu3  ;;  %v1946_v34 = vpop.f32.mrf.mxu2 }
 0x522   : > { %v1977_v29 = vadd.f32 %v1971_v28, %v1944_v26 }
 0x524   : > { %v1983_v32 = vadd.f32 %v2443_v15, %v1977_v29 }
 0x526   : > { %v1985_v36 = vadd.f32 %v1983_v32, %v1600_v30  ;;  %v1919_v37 = vpop.f32.mrf.mxu1 }
 0x527   : > { %v1947_v38 = vadd.f32 %v1946_v34, %v1919_v37 }
 0x528   : > { %1987 = vst.msk [vmem:[%s726_s26] sm:$0xff] %vm1894_vm8, %v1985_v36 }
 0x529   : > { %v1974_v25 = vpop.f32.mrf.mxu3 }
 0x52a   : > { %v1978_v39 = vadd.f32 %v1974_v25, %v1947_v38 }
 0x52c   : > { %v1984_v44 = vadd.f32 %v2443_v15, %v1978_v39 }
 0x52e   : > { %v1986_v45 = vadd.f32 %v1984_v44, %v1603_v41 }
 0x530   : > { %1988 = vst.msk [vmem:[%s726_s26 + $0x8] sm:$0xff] %vm1894_vm8, %v1986_v45 }
 0x531   : > { %2879 = shalt.err (!%p2876_p8)
}
 0x532   : > { %s2960_s7 = smov 128   ;;  %s2961_s22 = smov 8  }
 0x533   : > { %2318 = dma.vmem_to_hbm [thread:$0]  (%p3090_p5), %s2003_s29, 256, %s2005_s18, %s1990_s28, %s2960_s7, %s2960_s7, %s2961_s22  }
 0x534 PF: > { %s3518_s27 = sld [smem:[#allocation33_spill]] }
 0x535   : > { %s3519_s30 = sld [smem:[#allocation31_spill]] }
 0x53a   : > { %p2385_p9 = scmp.ge.s32.totalorder %s3518_s27, 2 }
 0x53b   : > { %s2019_s19 = sand.u32 1, %s3519_s30  }
 0x53c   : > { %p2358_p10 = pnand %p2385_p9, %p3094_p6  ;;  %s2020_s26 = scalar_lea.sflag [#allocation4], %s2019_s19 }
 0x53e   : > { %p2359_p11 = pneg %p2358_p10 }
 0x540   : > { %2925 = dma.done.wait (%p2359_p11), %s2020_s26, 256  }
 0x541   : > { %2927 = vsyncadd (%p2359_p11), %s2020_s26, 4294967040  ;;  %s3521_s27 = sld [smem:[#allocation34_spill]]  ;;  %s3524_s24 = smov %s2934_s25 }
 0x542   : > { %s3522_s1 = sld [smem:[#allocation32_spill]] }
 0x543   : > { %s3523_s26 = sld [smem:[#allocation35_spill]] }
 0x547   : > { %p34_p12 = scmp.ge.s32.totalorder %s3521_s27, 4  }
 0x548   : > { %s3525_s25 = smov %s3522_s1 }
 0x549   :  { %36 = sbr.rel (!%p34_p12) target bundleno = 18 (0x12), region = 184 }
 0x54e   :  { %2026 = vsyncpa [#allocation3], 1 }
 0x54f   :  { %2028 = vsyncpa [#allocation3 + $0x1], 1 }
 0x550   :  { %2029 = vsyncpa [#allocation6], 1 }
 0x551   :  { %2030 = vsyncpa [#allocation9], 1 }
 0x552   :  { %2031 = vsyncpa [#allocation12], 1 }
 0x553   :  { %2032 = vsyncpa [#allocation15], 1 }
 0x554   :  { %2033 = vsyncpa [#allocation18], 1 }
 0x555   :  { %2034 = vsyncpa [#allocation21], 1 }
 0x556   :  { %2035 = vsyncpa [#allocation4], 1 }
 0x557   :  { %2037 = vsyncpa [#allocation4 + $0x1], 1 }

</bundles_post_ra>
